<compile_context>
chip_gen: v5e
topology: v5e:2x2
jax: 0.10.0
libtpu: 0.0.40
codegen_flags: <defaults>
</compile_context>

<pallas_src>
import functools

import jax
import jax.numpy as jnp
from jax import lax
from jax.experimental import pallas as pl
from jax.experimental.pallas import tpu as pltpu

EPS = 1e-5


def _round_up(x, m):
    return (x + m - 1) // m * m


def _pick_tile(dim, cap, mult):
    """Largest tile t <= cap with t % mult == 0 and dim % t == 0.

    Falls back to the full dim (always a legal Mosaic block) when dim <= cap and
    pads the dim only as a last resort (never hit for ResNet-style shapes).
    Returns (tile, padded_dim)."""
    for t in range(min(cap, dim), mult - 1, -1):
        if t % mult == 0 and dim % t == 0:
            return t, dim
    if dim <= cap:
        return dim, dim
    padded = _round_up(dim, mult)
    for t in range(min(cap, padded), mult - 1, -1):
        if t % mult == 0 and padded % t == 0:
            return t, padded
    return mult, padded


def _pick_rows(ho, wo, cap=256):
    """Largest divisor tr of ho with tr * wo <= cap (3x3-conv row tile)."""
    tr = 1
    for c in range(1, ho + 1):
        if ho % c == 0 and c * wo <= cap:
            tr = c
    return tr


def _mosaic_params(sem, est_bytes):
    """dimension_semantics + a VMEM limit sized from the actual block footprint."""
    limit = int(min(48 * 2**20, max(2 * est_bytes, 32 * 2**20)))
    return pltpu.CompilerParams(dimension_semantics=sem, vmem_limit_bytes=limit)


def _pad2d(a, rows, cols, dtype):
    a = a.astype(dtype)
    r, c = a.shape
    if (r, c) == (rows, cols):
        return a
    return jnp.zeros((rows, cols), dtype).at[:r, :c].set(a)


# ----------------------------- Pallas kernels -----------------------------

def _matmul_bn_kernel(x_ref, w_ref, s_ref, b_ref, *rest, relu, has_res, multi_k):
    """Tiled (M,K)@(K,N) with fused BN scale/shift (+ residual add, + ReLU)."""
    rest = list(rest)
    r_ref = rest.pop(0) if has_res else None
    o_ref = rest.pop(0)
    acc_ref = rest.pop(0) if multi_k else None

    part = jnp.dot(x_ref[...], w_ref[...], preferred_element_type=jnp.float32)

    def _epilogue(acc):
        y = acc * s_ref[...] + b_ref[...]
        if r_ref is not None:
            y = y + r_ref[...].astype(jnp.float32)
        if relu:
            y = jnp.maximum(y, 0.0)
        o_ref[...] = y.astype(o_ref.dtype)

    if not multi_k:
        # Single K step: skip the accumulator round trip entirely.
        _epilogue(part)
    else:
        k = pl.program_id(2)

        @pl.when(k == 0)
        def _init():
            acc_ref[...] = jnp.zeros_like(acc_ref)

        acc_ref[...] += part

        @pl.when(k == pl.num_programs(2) - 1)
        def _fin():
            _epilogue(acc_ref[...])


def _conv3x3_bn_relu_kernel(xv_ref, w_ref, s_ref, b_ref, o_ref, patch_ref, *,
                            stride, tr, wo, cm):
    """3x3 conv (+BN +ReLU) for one (image, row-tile) as ONE K=9*Cin matmul.

    xv_ref:    (1, Hp/s, s, Wp/s, s*Cin)  stride-phase folded padded image (VMEM)
    w_ref:     (9*Cin, Cout)              taps flattened into the K dim
    o_ref:     (1, tr, wo, Cout)          output rows written in final layout
    patch_ref: (tr*wo, 9*Cin)             VMEM im2col scratch
    """
    s = stride
    t = pl.program_id(1)
    r0 = t * tr
    mt = tr * wo

    # Assemble the im2col patch in VMEM: each tap is a contiguous sublane window
    # (offset 0/1) and a lane-aligned channel slice (Cin is a multiple of 128).
    for kh in range(3):
        for kw in range(3):
            win = xv_ref[0,
                         pl.ds(r0 + kh // s, tr),
                         kh % s,
                         pl.ds(kw // s, wo),
                         pl.ds((kw % s) * cm, cm)]            # (tr, wo, cm)
            tap = kh * 3 + kw
            patch_ref[:, tap * cm:(tap + 1) * cm] = win.reshape(mt, cm)

    # One deep matmul on the MXU, then the fused BN + ReLU epilogue.
    y = jnp.dot(patch_ref[...], w_ref[...], preferred_element_type=jnp.float32)
    y = y * s_ref[...] + b_ref[...]
    y = jnp.maximum(y, 0.0)
    o_ref[0] = y.astype(o_ref.dtype).reshape(tr, wo, cm)


# ----------------------------- Pallas wrappers -----------------------------

def matmul_bn(x, w, scale, shift, *, relu, residual=None, out_dtype=jnp.bfloat16):
    """(M,K)@(K,N) with fused BN (+residual, +ReLU). bf16 MXU inputs, f32 acc."""
    M, K = x.shape
    N = w.shape[1]

    tm, Mp = _pick_tile(M, 512, 8)
    tn, Np = _pick_tile(N, 512, 128)
    tk, Kp = _pick_tile(K, 512, 128)

    # v7x megacore: keep at least 2 parallel blocks when cheaply possible.
    if (Mp // tm) * (Np // tn) < 2 and tm % 16 == 0:
        tm //= 2

    xb = _pad2d(x, Mp, Kp, jnp.bfloat16)
    wb = _pad2d(w, Kp, Np, jnp.bfloat16)
    sb = _pad2d(scale.reshape(1, N), 1, Np, jnp.float32)
    bb = _pad2d(shift.reshape(1, N), 1, Np, jnp.float32)

    nk = Kp // tk
    multi_k = nk > 1
    has_res = residual is not None

    if multi_k:
        grid = (Mp // tm, Np // tn, nk)
        in_specs = [
            pl.BlockSpec((tm, tk), lambda i, j, k: (i, k)),
            pl.BlockSpec((tk, tn), lambda i, j, k: (k, j)),
            pl.BlockSpec((1, tn), lambda i, j, k: (0, j)),
            pl.BlockSpec((1, tn), lambda i, j, k: (0, j)),
        ]
        res_spec = pl.BlockSpec((tm, tn), lambda i, j, k: (i, j))
        out_spec = pl.BlockSpec((tm, tn), lambda i, j, k: (i, j))
        scratch = [pltpu.VMEM((tm, tn), jnp.float32)]
        sem = ("parallel", "parallel", "arbitrary")
    else:
        grid = (Mp // tm, Np // tn)
        in_specs = [
            pl.BlockSpec((tm, tk), lambda i, j: (i, 0)),
            pl.BlockSpec((tk, tn), lambda i, j: (0, j)),
            pl.BlockSpec((1, tn), lambda i, j: (0, j)),
            pl.BlockSpec((1, tn), lambda i, j: (0, j)),
        ]
        res_spec = pl.BlockSpec((tm, tn), lambda i, j: (i, j))
        out_spec = pl.BlockSpec((tm, tn), lambda i, j: (i, j))
        scratch = []
        sem = ("parallel", "parallel")

    args = [xb, wb, sb, bb]
    if has_res:
        in_specs.append(res_spec)
        args.append(_pad2d(residual, Mp, Np, jnp.bfloat16))

    est = (2 * (tm * tk + tk * tn) * 2            # x / w blocks, double-buffered
           + 2 * tm * tn * jnp.dtype(out_dtype).itemsize
           + (2 * tm * tn * 2 if has_res else 0)
           + (tm * tn * 4 if multi_k else 0)
           + 4 * tn * 4 * 2)

    out = pl.pallas_call(
        functools.partial(_matmul_bn_kernel, relu=relu, has_res=has_res,
                          multi_k=multi_k),
        out_shape=jax.ShapeDtypeStruct((Mp, Np), out_dtype),
        grid=grid,
        in_specs=in_specs,
        out_specs=out_spec,
        scratch_shapes=scratch,
        compiler_params=_mosaic_params(sem, est),
    )(*args)
    if (Mp, Np) != (M, N):
        out = out[:M, :N]
    return out


def conv1x1_bn(x, w, scale, shift, *, stride=1, relu=False, residual=None,
               out_dtype=jnp.bfloat16):
    """1x1 conv (optionally strided) + BN (+residual, +ReLU) as a tiled matmul."""
    if stride > 1:
        # TODO(synk): fold this subsample into the matmul BlockSpec to avoid one
        #             un-hidden XLA gather pass (see header).
        x = x[:, ::stride, ::stride, :]
    N, H, W, Cin = x.shape
    Cout = w.shape[-1]
    res = None if residual is None else residual.reshape(N * H * W, Cout)
    out = matmul_bn(x.reshape(N * H * W, Cin), w, scale, shift,
                    relu=relu, residual=res, out_dtype=out_dtype)
    return out.reshape(N, H, W, Cout)


def conv3x3_bn_relu(x, w, scale, shift, *, stride):
    """3x3 conv (pad=1, stride s) + BN + ReLU.  Channels must be a multiple of 128."""
    N, H, W, C = x.shape
    s = stride
    cm = w.shape[-1]
    assert C == w.shape[2] == cm and cm % 128 == 0, (C, w.shape)

    ho = (H + 2 - 3) // s + 1
    wo = (W + 2 - 3) // s + 1

    # Spatial pad, sized so the free phase-folding reshape below is exact and
    # every in-kernel window stays in bounds.
    hp = s * (ho + 2 // s)
    wp = s * (wo + 2 // s)
    xp = jnp.pad(x.astype(jnp.bfloat16),
                 ((0, 0), (1, hp - H - 1), (1, wp - W - 1), (0, 0)))
    hq, wq = hp // s, wp // s
    xv = xp.reshape(N, hq, s, wq, s * cm)            # free reshape (row-major)

    tr = _pick_rows(ho, wo, cap=256)
    mt = tr * wo

    wf = w.reshape(9 * cm, cm).astype(jnp.bfloat16)
    sc = scale.reshape(1, cm).astype(jnp.float32)
    sh = shift.reshape(1, cm).astype(jnp.float32)

    est = (2 * hp * wp * cm * 2        # whole padded image, double-buffered
           + 2 * 9 * cm * cm * 2       # weights (index-constant, re-DMA skipped)
           + mt * 9 * cm * 2           # im2col patch scratch
           + 2 * mt * cm * 2           # output blocks
           + 4 * cm * 4 * 2)

    return pl.pallas_call(
        functools.partial(_conv3x3_bn_relu_kernel, stride=s, tr=tr, wo=wo, cm=cm),
        out_shape=jax.ShapeDtypeStruct((N, ho, wo, cm), jnp.bfloat16),
        grid=(N, ho // tr),
        in_specs=[
            pl.BlockSpec((1, hq, s, wq, s * cm), lambda n, t: (n, 0, 0, 0, 0)),
            pl.BlockSpec((9 * cm, cm), lambda n, t: (0, 0)),
            pl.BlockSpec((1, cm), lambda n, t: (0, 0)),
            pl.BlockSpec((1, cm), lambda n, t: (0, 0)),
        ],
        out_specs=pl.BlockSpec((1, tr, wo, cm), lambda n, t: (n, t, 0, 0)),
        scratch_shapes=[pltpu.VMEM((mt, 9 * cm), jnp.bfloat16)],
        compiler_params=_mosaic_params(("parallel", "parallel"), est),
    )(xv, wf, sc, sh)


# ----------------------------- parameters -----------------------------

def _kaiming_conv(key, kh, kw, cin, cout):
    fan_out = cout * kh * kw
    std = (2.0 / fan_out) ** 0.5
    return jax.random.normal(key, (kh, kw, cin, cout), jnp.float32) * std


def _bn_fold(key, c):
    """Inference-mode BN folded into (scale, shift) with non-trivial random stats."""
    k1, k2, k3, k4 = jax.random.split(key, 4)
    gamma = 1.0 + 0.3 * jax.random.normal(k1, (c,), jnp.float32)
    beta = 0.2 * jax.random.normal(k2, (c,), jnp.float32)
    mean = 0.2 * jax.random.normal(k3, (c,), jnp.float32)
    var = jax.random.uniform(k4, (c,), jnp.float32, minval=0.5, maxval=1.5)
    scale = gamma / jnp.sqrt(var + EPS)
    return scale, beta - mean * scale


def init_bottleneck_params(key, in_channel, out_channel, stride, with_downsample):
    """Raw (unpadded, f32) parameters of the Bottleneck block."""
    expansion = 4
    c4 = out_channel * expansion
    k = jax.random.split(key, 8)
    p = {
        "stride": stride,
        "conv1": _kaiming_conv(k[0], 1, 1, in_channel, out_channel
                               ).reshape(in_channel, out_channel),
        "bn1": _bn_fold(k[1], out_channel),
        "conv2": _kaiming_conv(k[2], 3, 3, out_channel, out_channel),
        "bn2": _bn_fold(k[3], out_channel),
        "conv3": _kaiming_conv(k[4], 1, 1, out_channel, c4).reshape(out_channel, c4),
        "bn3": _bn_fold(k[5], c4),
    }
    if with_downsample:
        p["down_conv"] = _kaiming_conv(k[6], 1, 1, in_channel, c4
                                       ).reshape(in_channel, c4)
        p["down_bn"] = _bn_fold(k[7], c4)
    return p


def prepare_params(p):
    """Kernel-ready params: channels zero-padded to multiples of 128, weights bf16.

    Zero padding (weights + scale + shift) keeps the padded channels exactly zero
    through every stage, so they can be trimmed for free at the very end."""
    cm = p["conv1"].shape[1]
    c4 = p["conv3"].shape[1]
    cm_pad = _round_up(cm, 128)
    c4_pad = _round_up(c4, 128)

    def pad_last(a, n):
        if a.shape[-1] == n:
            return a
        return jnp.pad(a, [(0, 0)] * (a.ndim - 1) + [(0, n - a.shape[-1])])

    def pad_bn(bn, n):
        s, b = bn
        return pad_last(s, n).astype(jnp.float32), pad_last(b, n).astype(jnp.float32)

    w2 = p["conv2"]
    if cm_pad != cm:
        w2 = jnp.pad(w2, ((0, 0), (0, 0), (0, cm_pad - cm), (0, cm_pad - cm)))
    w3 = pad_last(p["conv3"], c4_pad)
    if cm_pad != cm:
        w3 = jnp.pad(w3, ((0, cm_pad - cm), (0, 0)))

    q = {
        "stride": p["stride"], "c4": c4, "c4_pad": c4_pad,
        "conv1": pad_last(p["conv1"], cm_pad).astype(jnp.bfloat16),
        "bn1": pad_bn(p["bn1"], cm_pad),
        "conv2": w2.astype(jnp.bfloat16),
        "bn2": pad_bn(p["bn2"], cm_pad),
        "conv3": w3.astype(jnp.bfloat16),
        "bn3": pad_bn(p["bn3"], c4_pad),
    }
    if "down_conv" in p:
        q["down_conv"] = pad_last(p["down_conv"], c4_pad).astype(jnp.bfloat16)
        q["down_bn"] = pad_bn(p["down_bn"], c4_pad)
    return q


# ----------------------------- forward pass -----------------------------

def bottleneck_forward(params, x_nchw):
    s = params["stride"]
    c4, c4_pad = params["c4"], params["c4_pad"]

    x = jnp.transpose(x_nchw, (0, 2, 3, 1)).astype(jnp.bfloat16)   # NCHW -> NHWC bf16

    out = conv1x1_bn(x, params["conv1"], *params["bn1"], relu=True)
    out = conv3x3_bn_relu(out, params["conv2"], *params["bn2"], stride=s)

    if "down_conv" in params:
        identity = conv1x1_bn(x, params["down_conv"], *params["down_bn"],
                              stride=s, relu=False)
    else:
        identity = x
        if identity.shape[-1] != c4_pad:
            identity = jnp.pad(identity,
                               ((0, 0), (0, 0), (0, 0),
                                (0, c4_pad - identity.shape[-1])))

    # conv3 + BN3 + residual add + ReLU fused in one kernel epilogue (bf16 out).
    out = conv1x1_bn(out, params["conv3"], *params["bn3"], relu=True,
                     residual=identity)
    if c4_pad != c4:
        out = out[..., :c4]          # fuses into the transpose below
    return jnp.transpose(out, (0, 3, 1, 2)).astype(jnp.float32)    # NHWC -> NCHW


# ----------------------------- pure-JAX reference -----------------------------

def bottleneck_ref(params, x_nchw):
    x = jnp.transpose(x_nchw, (0, 2, 3, 1))
    s = params["stride"]
    sc1, sh1 = params["bn1"]
    sc2, sh2 = params["bn2"]
    sc3, sh3 = params["bn3"]
    out = jnp.maximum(jnp.einsum("nhwc,cd->nhwd", x, params["conv1"]) * sc1 + sh1, 0.0)
    out = lax.conv_general_dilated(out, params["conv2"], (s, s), ((1, 1), (1, 1)),
                                   dimension_numbers=("NHWC", "HWIO", "NHWC"))
    out = jnp.maximum(out * sc2 + sh2, 0.0)
    out = jnp.einsum("nhwc,cd->nhwd", out, params["conv3"]) * sc3 + sh3
    if "down_conv" in params:
        dsc, dsh = params["down_bn"]
        identity = jnp.einsum("nhwc,cd->nhwd", x[:, ::s, ::s, :],
                              params["down_conv"]) * dsc + dsh
    else:
        identity = x
    out = jnp.maximum(out + identity, 0.0)
    return jnp.transpose(out, (0, 3, 1, 2))


# ----------------------------- main -----------------------------

if __name__ == "__main__":
    root = jax.random.PRNGKey(0)
    kp1, kx1, kp2, kx2 = jax.random.split(root, 4)

    # Case A: downsampling bottleneck (stride 2, 64 -> 32*4 channels, downsample).
    raw_a = init_bottleneck_params(kp1, in_channel=64, out_channel=32,
                                   stride=2, with_downsample=True)
    prep_a = prepare_params(raw_a)
    x_a = jax.random.normal(kx1, (2, 64, 16, 16), jnp.float32)
    fwd_a = jax.jit(functools.partial(bottleneck_forward, prep_a))
    out_a = jax.block_until_ready(fwd_a(x_a))
    ref_a = bottleneck_ref(raw_a, x_a)
    assert out_a.shape == (2, 128, 8, 8), out_a.shape
    assert bool(jnp.all(jnp.isfinite(out_a)))
    assert bool(jnp.allclose(out_a, ref_a, rtol=1e-1, atol=2e-1)), \
        float(jnp.max(jnp.abs(out_a - ref_a)))

    # Case B: identity-shortcut bottleneck (stride 1, in_channel == out_channel*4).
    raw_b = init_bottleneck_params(kp2, in_channel=128, out_channel=32,
                                   stride=1, with_downsample=False)
    prep_b = prepare_params(raw_b)
    x_b = jax.random.normal(kx2, (2, 128, 16, 16), jnp.float32)
    fwd_b = jax.jit(functools.partial(bottleneck_forward, prep_b))
    out_b = jax.block_until_ready(fwd_b(x_b))
    ref_b = bottleneck_ref(raw_b, x_b)
    assert out_b.shape == (2, 128, 16, 16), out_b.shape
    assert bool(jnp.all(jnp.isfinite(out_b)))
    assert bool(jnp.allclose(out_b, ref_b, rtol=1e-1, atol=2e-1)), \
        float(jnp.max(jnp.abs(out_b - ref_b)))

    print("KERNEL_OK")
</pallas_src>

<mosaic_0001>
module attributes {stable_mosaic.version = 11 : i64} {
  func.func @_matmul_bn_kernel(%arg0: i32, %arg1: i32, %arg2: memref<256x64xbf16, #tpu.memory_space<vmem>>, %arg3: memref<64x128xbf16, #tpu.memory_space<vmem>>, %arg4: memref<1x128xf32, #tpu.memory_space<vmem>>, %arg5: memref<1x128xf32, #tpu.memory_space<vmem>>, %arg6: memref<256x128xbf16, #tpu.memory_space<vmem>>) attributes {dimension_semantics = [#tpu.dimension_semantics<parallel>, #tpu.dimension_semantics<parallel>], iteration_bounds = array<i64: 2, 1>, scalar_prefetch = 0 : i64, scratch_operands = 0 : i64, tpu.core_type = #tpu.core_type<tc>, window_params = [{transform_indices = @transform_0, window_bounds = array<i64: 256, 64>}, {transform_indices = @transform_1, window_bounds = array<i64: 64, 128>}, {transform_indices = @transform_2, window_bounds = array<i64: 1, 128>}, {transform_indices = @transform_3, window_bounds = array<i64: 1, 128>}, {transform_indices = @transform_4, window_bounds = array<i64: 256, 128>}]} {
    %c0 = arith.constant 0 : index
    %c0_0 = arith.constant 0 : index
    %0 = vector.load %arg2[%c0, %c0_0] : memref<256x64xbf16, #tpu.memory_space<vmem>>, vector<256x64xbf16>
    %c0_1 = arith.constant 0 : index
    %c0_2 = arith.constant 0 : index
    %1 = vector.load %arg3[%c0_1, %c0_2] : memref<64x128xbf16, #tpu.memory_space<vmem>>, vector<64x128xbf16>
    %cst = arith.constant dense<0.000000e+00> : vector<256x128xf32>
    %2 = tpu.matmul %0, %1, %cst {dimension_numbers = #tpu.dot_dimension_numbers<[1], [0], [0], [1], [0, 0, 1, 1], [], []>} : vector<256x64xbf16>, vector<64x128xbf16>, vector<256x128xf32> -> vector<256x128xf32>
    %c0_3 = arith.constant 0 : index
    %c0_4 = arith.constant 0 : index
    %3 = vector.load %arg4[%c0_3, %c0_4] : memref<1x128xf32, #tpu.memory_space<vmem>>, vector<1x128xf32>
    %4 = vector.broadcast %3 : vector<1x128xf32> to vector<256x128xf32>
    %5 = arith.mulf %2, %4 : vector<256x128xf32>
    %c0_5 = arith.constant 0 : index
    %c0_6 = arith.constant 0 : index
    %6 = vector.load %arg5[%c0_5, %c0_6] : memref<1x128xf32, #tpu.memory_space<vmem>>, vector<1x128xf32>
    %7 = vector.broadcast %6 : vector<1x128xf32> to vector<256x128xf32>
    %8 = arith.addf %5, %7 : vector<256x128xf32>
    %cst_7 = arith.constant 0.000000e+00 : f32
    %9 = vector.broadcast %cst_7 : f32 to vector<256x128xf32>
    %10 = arith.maximumf %8, %9 : vector<256x128xf32>
    %11 = arith.truncf %10 : vector<256x128xf32> to vector<256x128xbf16>
    %c0_8 = arith.constant 0 : index
    %c0_9 = arith.constant 0 : index
    %12 = vector.load %arg6[%c0_8, %c0_9] : memref<256x128xbf16, #tpu.memory_space<vmem>>, vector<256x128xbf16>
    tpu.vector_store %arg6[%c0_8, %c0_9], %11 {strides = array<i32>} : memref<256x128xbf16, #tpu.memory_space<vmem>>, vector<256x128xbf16>,
    return
  }
  func.func @transform_0(%arg0: i32, %arg1: i32) -> (i32, i32) {
    %c0_i32 = arith.constant 0 : i32
    %c0_i32_0 = arith.constant 0 : i32
    return %arg0, %c0_i32 : i32, i32
  }
  func.func @transform_1(%arg0: i32, %arg1: i32) -> (i32, i32) {
    %c0_i32 = arith.constant 0 : i32
    %c0_i32_0 = arith.constant 0 : i32
    return %c0_i32, %arg1 : i32, i32
  }
  func.func @transform_2(%arg0: i32, %arg1: i32) -> (i32, i32) {
    %c0_i32 = arith.constant 0 : i32
    %c0_i32_0 = arith.constant 0 : i32
    return %c0_i32, %arg1 : i32, i32
  }
  func.func @transform_3(%arg0: i32, %arg1: i32) -> (i32, i32) {
    %c0_i32 = arith.constant 0 : i32
    %c0_i32_0 = arith.constant 0 : i32
    return %c0_i32, %arg1 : i32, i32
  }
  func.func @transform_4(%arg0: i32, %arg1: i32) -> (i32, i32) {
    %c0_i32 = arith.constant 0 : i32
    return %arg0, %arg1 : i32, i32
  }
}

module attributes {stable_mosaic.version = 11 : i64} {
  func.func @_conv3x3_bn_relu_kernel(%arg0: i32, %arg1: i32, %arg2: memref<1x9x2x9x256xbf16, #tpu.memory_space<vmem>>, %arg3: memref<1152x128xbf16, #tpu.memory_space<vmem>>, %arg4: memref<1x128xf32, #tpu.memory_space<vmem>>, %arg5: memref<1x128xf32, #tpu.memory_space<vmem>>, %arg6: memref<1x8x8x128xbf16, #tpu.memory_space<vmem>>, %arg7: memref<64x1152xbf16, #tpu.memory_space<vmem>>) attributes {dimension_semantics = [#tpu.dimension_semantics<parallel>, #tpu.dimension_semantics<parallel>], iteration_bounds = array<i64: 2, 1>, scalar_prefetch = 0 : i64, scratch_operands = 1 : i64, tpu.core_type = #tpu.core_type<tc>, window_params = [{transform_indices = @transform_0, window_bounds = array<i64: 1, 9, 2, 9, 256>}, {pipeline_mode = #tpu.pipeline_mode<synchronous>, transform_indices = @transform_1, window_bounds = array<i64: 1152, 128>}, {pipeline_mode = #tpu.pipeline_mode<synchronous>, transform_indices = @transform_2, window_bounds = array<i64: 1, 128>}, {pipeline_mode = #tpu.pipeline_mode<synchronous>, transform_indices = @transform_3, window_bounds = array<i64: 1, 128>}, {transform_indices = @transform_4, window_bounds = array<i64: 1, 8, 8, 128>}]} {
    %c8_i32 = arith.constant 8 : i32
    %0 = arith.muli %arg1, %c8_i32 : i32
    %c0_i32 = arith.constant 0 : i32
    %1 = arith.addi %0, %c0_i32 : i32
    %c0 = arith.constant 0 : index
    %2 = arith.index_cast %1 : i32 to index
    %c0_0 = arith.constant 0 : index
    %c0_1 = arith.constant 0 : index
    %c0_2 = arith.constant 0 : index
    %3 = vector.load %arg2[%c0, %2, %c0_0, %c0_1, %c0_2] : memref<1x9x2x9x256xbf16, #tpu.memory_space<vmem>>, vector<1x8x1x8x128xbf16>
    %4 = vector.shape_cast %3 : vector<1x8x1x8x128xbf16> to vector<8x8x128xbf16>
    %5 = vector.shape_cast %4 : vector<8x8x128xbf16> to vector<64x128xbf16>
    %c0_3 = arith.constant 0 : index
    %c0_4 = arith.constant 0 : index
    %6 = vector.load %arg7[%c0_3, %c0_4] : memref<64x1152xbf16, #tpu.memory_space<vmem>>, vector<64x128xbf16>
    tpu.vector_store %arg7[%c0_3, %c0_4], %5 {strides = array<i32>} : memref<64x1152xbf16, #tpu.memory_space<vmem>>, vector<64x128xbf16>,
    %c0_i32_5 = arith.constant 0 : i32
    %7 = arith.addi %0, %c0_i32_5 : i32
    %c0_6 = arith.constant 0 : index
    %8 = arith.index_cast %7 : i32 to index
    %c0_7 = arith.constant 0 : index
    %c0_8 = arith.constant 0 : index
    %c128 = arith.constant 128 : index
    %9 = vector.load %arg2[%c0_6, %8, %c0_7, %c0_8, %c128] : memref<1x9x2x9x256xbf16, #tpu.memory_space<vmem>>, vector<1x8x1x8x128xbf16>
    %10 = vector.shape_cast %9 : vector<1x8x1x8x128xbf16> to vector<8x8x128xbf16>
    %11 = vector.shape_cast %10 : vector<8x8x128xbf16> to vector<64x128xbf16>
    %c0_9 = arith.constant 0 : index
    %c128_10 = arith.constant 128 : index
    %12 = vector.load %arg7[%c0_9, %c128_10] : memref<64x1152xbf16, #tpu.memory_space<vmem>>, vector<64x128xbf16>
    tpu.vector_store %arg7[%c0_9, %c128_10], %11 {strides = array<i32>} : memref<64x1152xbf16, #tpu.memory_space<vmem>>, vector<64x128xbf16>,
    %c0_i32_11 = arith.constant 0 : i32
    %13 = arith.addi %0, %c0_i32_11 : i32
    %c0_12 = arith.constant 0 : index
    %14 = arith.index_cast %13 : i32 to index
    %c0_13 = arith.constant 0 : index
    %c1 = arith.constant 1 : index
    %c0_14 = arith.constant 0 : index
    %15 = vector.load %arg2[%c0_12, %14, %c0_13, %c1, %c0_14] : memref<1x9x2x9x256xbf16, #tpu.memory_space<vmem>>, vector<1x8x1x8x128xbf16>
    %16 = vector.shape_cast %15 : vector<1x8x1x8x128xbf16> to vector<8x8x128xbf16>
    %17 = vector.shape_cast %16 : vector<8x8x128xbf16> to vector<64x128xbf16>
    %c0_15 = arith.constant 0 : index
    %c256 = arith.constant 256 : index
    %18 = vector.load %arg7[%c0_15, %c256] : memref<64x1152xbf16, #tpu.memory_space<vmem>>, vector<64x128xbf16>
    tpu.vector_store %arg7[%c0_15, %c256], %17 {strides = array<i32>} : memref<64x1152xbf16, #tpu.memory_space<vmem>>, vector<64x128xbf16>,
    %c0_i32_16 = arith.constant 0 : i32
    %19 = arith.addi %0, %c0_i32_16 : i32
    %c0_17 = arith.constant 0 : index
    %20 = arith.index_cast %19 : i32 to index
    %c1_18 = arith.constant 1 : index
    %c0_19 = arith.constant 0 : index
    %c0_20 = arith.constant 0 : index
    %21 = vector.load %arg2[%c0_17, %20, %c1_18, %c0_19, %c0_20] : memref<1x9x2x9x256xbf16, #tpu.memory_space<vmem>>, vector<1x8x1x8x128xbf16>
    %22 = vector.shape_cast %21 : vector<1x8x1x8x128xbf16> to vector<8x8x128xbf16>
    %23 = vector.shape_cast %22 : vector<8x8x128xbf16> to vector<64x128xbf16>
    %c0_21 = arith.constant 0 : index
    %c384 = arith.constant 384 : index
    %24 = vector.load %arg7[%c0_21, %c384] : memref<64x1152xbf16, #tpu.memory_space<vmem>>, vector<64x128xbf16>
    tpu.vector_store %arg7[%c0_21, %c384], %23 {strides = array<i32>} : memref<64x1152xbf16, #tpu.memory_space<vmem>>, vector<64x128xbf16>,
    %c0_i32_22 = arith.constant 0 : i32
    %25 = arith.addi %0, %c0_i32_22 : i32
    %c0_23 = arith.constant 0 : index
    %26 = arith.index_cast %25 : i32 to index
    %c1_24 = arith.constant 1 : index
    %c0_25 = arith.constant 0 : index
    %c128_26 = arith.constant 128 : index
    %27 = vector.load %arg2[%c0_23, %26, %c1_24, %c0_25, %c128_26] : memref<1x9x2x9x256xbf16, #tpu.memory_space<vmem>>, vector<1x8x1x8x128xbf16>
    %28 = vector.shape_cast %27 : vector<1x8x1x8x128xbf16> to vector<8x8x128xbf16>
    %29 = vector.shape_cast %28 : vector<8x8x128xbf16> to vector<64x128xbf16>
    %c0_27 = arith.constant 0 : index
    %c512 = arith.constant 512 : index
    %30 = vector.load %arg7[%c0_27, %c512] : memref<64x1152xbf16, #tpu.memory_space<vmem>>, vector<64x128xbf16>
    tpu.vector_store %arg7[%c0_27, %c512], %29 {strides = array<i32>} : memref<64x1152xbf16, #tpu.memory_space<vmem>>, vector<64x128xbf16>,
    %c0_i32_28 = arith.constant 0 : i32
    %31 = arith.addi %0, %c0_i32_28 : i32
    %c0_29 = arith.constant 0 : index
    %32 = arith.index_cast %31 : i32 to index
    %c1_30 = arith.constant 1 : index
    %c1_31 = arith.constant 1 : index
    %c0_32 = arith.constant 0 : index
    %33 = vector.load %arg2[%c0_29, %32, %c1_30, %c1_31, %c0_32] : memref<1x9x2x9x256xbf16, #tpu.memory_space<vmem>>, vector<1x8x1x8x128xbf16>
    %34 = vector.shape_cast %33 : vector<1x8x1x8x128xbf16> to vector<8x8x128xbf16>
    %35 = vector.shape_cast %34 : vector<8x8x128xbf16> to vector<64x128xbf16>
    %c0_33 = arith.constant 0 : index
    %c640 = arith.constant 640 : index
    %36 = vector.load %arg7[%c0_33, %c640] : memref<64x1152xbf16, #tpu.memory_space<vmem>>, vector<64x128xbf16>
    tpu.vector_store %arg7[%c0_33, %c640], %35 {strides = array<i32>} : memref<64x1152xbf16, #tpu.memory_space<vmem>>, vector<64x128xbf16>,
    %c1_i32 = arith.constant 1 : i32
    %37 = arith.addi %0, %c1_i32 : i32
    %c0_34 = arith.constant 0 : index
    %38 = arith.index_cast %37 : i32 to index
    %c0_35 = arith.constant 0 : index
    %c0_36 = arith.constant 0 : index
    %c0_37 = arith.constant 0 : index
    %39 = vector.load %arg2[%c0_34, %38, %c0_35, %c0_36, %c0_37] : memref<1x9x2x9x256xbf16, #tpu.memory_space<vmem>>, vector<1x8x1x8x128xbf16>
    %40 = vector.shape_cast %39 : vector<1x8x1x8x128xbf16> to vector<8x8x128xbf16>
    %41 = vector.shape_cast %40 : vector<8x8x128xbf16> to vector<64x128xbf16>
    %c0_38 = arith.constant 0 : index
    %c768 = arith.constant 768 : index
    %42 = vector.load %arg7[%c0_38, %c768] : memref<64x1152xbf16, #tpu.memory_space<vmem>>, vector<64x128xbf16>
    tpu.vector_store %arg7[%c0_38, %c768], %41 {strides = array<i32>} : memref<64x1152xbf16, #tpu.memory_space<vmem>>, vector<64x128xbf16>,
    %c1_i32_39 = arith.constant 1 : i32
    %43 = arith.addi %0, %c1_i32_39 : i32
    %c0_40 = arith.constant 0 : index
    %44 = arith.index_cast %43 : i32 to index
    %c0_41 = arith.constant 0 : index
    %c0_42 = arith.constant 0 : index
    %c128_43 = arith.constant 128 : index
    %45 = vector.load %arg2[%c0_40, %44, %c0_41, %c0_42, %c128_43] : memref<1x9x2x9x256xbf16, #tpu.memory_space<vmem>>, vector<1x8x1x8x128xbf16>
    %46 = vector.shape_cast %45 : vector<1x8x1x8x128xbf16> to vector<8x8x128xbf16>
    %47 = vector.shape_cast %46 : vector<8x8x128xbf16> to vector<64x128xbf16>
    %c0_44 = arith.constant 0 : index
    %c896 = arith.constant 896 : index
    %48 = vector.load %arg7[%c0_44, %c896] : memref<64x1152xbf16, #tpu.memory_space<vmem>>, vector<64x128xbf16>
    tpu.vector_store %arg7[%c0_44, %c896], %47 {strides = array<i32>} : memref<64x1152xbf16, #tpu.memory_space<vmem>>, vector<64x128xbf16>,
    %c1_i32_45 = arith.constant 1 : i32
    %49 = arith.addi %0, %c1_i32_45 : i32
    %c0_46 = arith.constant 0 : index
    %50 = arith.index_cast %49 : i32 to index
    %c0_47 = arith.constant 0 : index
    %c1_48 = arith.constant 1 : index
    %c0_49 = arith.constant 0 : index
    %51 = vector.load %arg2[%c0_46, %50, %c0_47, %c1_48, %c0_49] : memref<1x9x2x9x256xbf16, #tpu.memory_space<vmem>>, vector<1x8x1x8x128xbf16>
    %52 = vector.shape_cast %51 : vector<1x8x1x8x128xbf16> to vector<8x8x128xbf16>
    %53 = vector.shape_cast %52 : vector<8x8x128xbf16> to vector<64x128xbf16>
    %c0_50 = arith.constant 0 : index
    %c1024 = arith.constant 1024 : index
    %54 = vector.load %arg7[%c0_50, %c1024] : memref<64x1152xbf16, #tpu.memory_space<vmem>>, vector<64x128xbf16>
    tpu.vector_store %arg7[%c0_50, %c1024], %53 {strides = array<i32>} : memref<64x1152xbf16, #tpu.memory_space<vmem>>, vector<64x128xbf16>,
    %c0_51 = arith.constant 0 : index
    %c0_52 = arith.constant 0 : index
    %55 = vector.load %arg7[%c0_51, %c0_52] : memref<64x1152xbf16, #tpu.memory_space<vmem>>, vector<64x1152xbf16>
    %c0_53 = arith.constant 0 : index
    %c0_54 = arith.constant 0 : index
    %56 = vector.load %arg3[%c0_53, %c0_54] : memref<1152x128xbf16, #tpu.memory_space<vmem>>, vector<1152x128xbf16>
    %cst = arith.constant dense<0.000000e+00> : vector<64x128xf32>
    %57 = tpu.matmul %55, %56, %cst {dimension_numbers = #tpu.dot_dimension_numbers<[1], [0], [0], [1], [0, 0, 1, 1], [], []>} : vector<64x1152xbf16>, vector<1152x128xbf16>, vector<64x128xf32> -> vector<64x128xf32>
    %c0_55 = arith.constant 0 : index
    %c0_56 = arith.constant 0 : index
    %58 = vector.load %arg4[%c0_55, %c0_56] : memref<1x128xf32, #tpu.memory_space<vmem>>, vector<1x128xf32>
    %59 = vector.broadcast %58 : vector<1x128xf32> to vector<64x128xf32>
    %60 = arith.mulf %57, %59 : vector<64x128xf32>
    %c0_57 = arith.constant 0 : index
    %c0_58 = arith.constant 0 : index
    %61 = vector.load %arg5[%c0_57, %c0_58] : memref<1x128xf32, #tpu.memory_space<vmem>>, vector<1x128xf32>
    %62 = vector.broadcast %61 : vector<1x128xf32> to vector<64x128xf32>
    %63 = arith.addf %60, %62 : vector<64x128xf32>
    %cst_59 = arith.constant 0.000000e+00 : f32
    %64 = vector.broadcast %cst_59 : f32 to vector<64x128xf32>
    %65 = arith.maximumf %63, %64 : vector<64x128xf32>
    %66 = arith.truncf %65 : vector<64x128xf32> to vector<64x128xbf16>
    %67 = vector.shape_cast %66 : vector<64x128xbf16> to vector<8x8x128xbf16>
    %c0_60 = arith.constant 0 : index
    %c0_61 = arith.constant 0 : index
    %c0_62 = arith.constant 0 : index
    %c0_63 = arith.constant 0 : index
    %68 = vector.load %arg6[%c0_60, %c0_61, %c0_62, %c0_63] : memref<1x8x8x128xbf16, #tpu.memory_space<vmem>>, vector<1x8x8x128xbf16>
    %69 = vector.shape_cast %68 : vector<1x8x8x128xbf16> to vector<8x8x128xbf16>
    %70 = vector.shape_cast %67 : vector<8x8x128xbf16> to vector<1x8x8x128xbf16>
    tpu.vector_store %arg6[%c0_60, %c0_61, %c0_62, %c0_63], %70 {strides = array<i32>} : memref<1x8x8x128xbf16, #tpu.memory_space<vmem>>, vector<1x8x8x128xbf16>,
    return
  }
  func.func @transform_0(%arg0: i32, %arg1: i32) -> (i32, i32, i32, i32, i32) {
    %c0_i32 = arith.constant 0 : i32
    %c0_i32_0 = arith.constant 0 : i32
    %c0_i32_1 = arith.constant 0 : i32
    %c0_i32_2 = arith.constant 0 : i32
    %c0_i32_3 = arith.constant 0 : i32
    return %arg0, %c0_i32, %c0_i32_0, %c0_i32_1, %c0_i32_2 : i32, i32, i32, i32, i32
  }
  func.func @transform_1(%arg0: i32, %arg1: i32) -> (i32, i32) {
    %c0_i32 = arith.constant 0 : i32
    %c0_i32_0 = arith.constant 0 : i32
    %c0_i32_1 = arith.constant 0 : i32
    return %c0_i32, %c0_i32_0 : i32, i32
  }
  func.func @transform_2(%arg0: i32, %arg1: i32) -> (i32, i32) {
    %c0_i32 = arith.constant 0 : i32
    %c0_i32_0 = arith.constant 0 : i32
    %c0_i32_1 = arith.constant 0 : i32
    return %c0_i32, %c0_i32_0 : i32, i32
  }
  func.func @transform_3(%arg0: i32, %arg1: i32) -> (i32, i32) {
    %c0_i32 = arith.constant 0 : i32
    %c0_i32_0 = arith.constant 0 : i32
    %c0_i32_1 = arith.constant 0 : i32
    return %c0_i32, %c0_i32_0 : i32, i32
  }
  func.func @transform_4(%arg0: i32, %arg1: i32) -> (i32, i32, i32, i32) {
    %c0_i32 = arith.constant 0 : i32
    %c0_i32_0 = arith.constant 0 : i32
    %c0_i32_1 = arith.constant 0 : i32
    return %arg0, %arg1, %c0_i32, %c0_i32_0 : i32, i32, i32, i32
  }
}

module attributes {stable_mosaic.version = 11 : i64} {
  func.func @_matmul_bn_kernel(%arg0: i32, %arg1: i32, %arg2: memref<64x64xbf16, #tpu.memory_space<vmem>>, %arg3: memref<64x128xbf16, #tpu.memory_space<vmem>>, %arg4: memref<1x128xf32, #tpu.memory_space<vmem>>, %arg5: memref<1x128xf32, #tpu.memory_space<vmem>>, %arg6: memref<64x128xbf16, #tpu.memory_space<vmem>>) attributes {dimension_semantics = [#tpu.dimension_semantics<parallel>, #tpu.dimension_semantics<parallel>], iteration_bounds = array<i64: 2, 1>, scalar_prefetch = 0 : i64, scratch_operands = 0 : i64, tpu.core_type = #tpu.core_type<tc>, window_params = [{transform_indices = @transform_0, window_bounds = array<i64: 64, 64>}, {transform_indices = @transform_1, window_bounds = array<i64: 64, 128>}, {transform_indices = @transform_2, window_bounds = array<i64: 1, 128>}, {transform_indices = @transform_3, window_bounds = array<i64: 1, 128>}, {transform_indices = @transform_4, window_bounds = array<i64: 64, 128>}]} {
    %c0 = arith.constant 0 : index
    %c0_0 = arith.constant 0 : index
    %0 = vector.load %arg2[%c0, %c0_0] : memref<64x64xbf16, #tpu.memory_space<vmem>>, vector<64x64xbf16>
    %c0_1 = arith.constant 0 : index
    %c0_2 = arith.constant 0 : index
    %1 = vector.load %arg3[%c0_1, %c0_2] : memref<64x128xbf16, #tpu.memory_space<vmem>>, vector<64x128xbf16>
    %cst = arith.constant dense<0.000000e+00> : vector<64x128xf32>
    %2 = tpu.matmul %0, %1, %cst {dimension_numbers = #tpu.dot_dimension_numbers<[1], [0], [0], [1], [0, 0, 1, 1], [], []>} : vector<64x64xbf16>, vector<64x128xbf16>, vector<64x128xf32> -> vector<64x128xf32>
    %c0_3 = arith.constant 0 : index
    %c0_4 = arith.constant 0 : index
    %3 = vector.load %arg4[%c0_3, %c0_4] : memref<1x128xf32, #tpu.memory_space<vmem>>, vector<1x128xf32>
    %4 = vector.broadcast %3 : vector<1x128xf32> to vector<64x128xf32>
    %5 = arith.mulf %2, %4 : vector<64x128xf32>
    %c0_5 = arith.constant 0 : index
    %c0_6 = arith.constant 0 : index
    %6 = vector.load %arg5[%c0_5, %c0_6] : memref<1x128xf32, #tpu.memory_space<vmem>>, vector<1x128xf32>
    %7 = vector.broadcast %6 : vector<1x128xf32> to vector<64x128xf32>
    %8 = arith.addf %5, %7 : vector<64x128xf32>
    %9 = arith.truncf %8 : vector<64x128xf32> to vector<64x128xbf16>
    %c0_7 = arith.constant 0 : index
    %c0_8 = arith.constant 0 : index
    %10 = vector.load %arg6[%c0_7, %c0_8] : memref<64x128xbf16, #tpu.memory_space<vmem>>, vector<64x128xbf16>
    tpu.vector_store %arg6[%c0_7, %c0_8], %9 {strides = array<i32>} : memref<64x128xbf16, #tpu.memory_space<vmem>>, vector<64x128xbf16>,
    return
  }
  func.func @transform_0(%arg0: i32, %arg1: i32) -> (i32, i32) {
    %c0_i32 = arith.constant 0 : i32
    %c0_i32_0 = arith.constant 0 : i32
    return %arg0, %c0_i32 : i32, i32
  }
  func.func @transform_1(%arg0: i32, %arg1: i32) -> (i32, i32) {
    %c0_i32 = arith.constant 0 : i32
    %c0_i32_0 = arith.constant 0 : i32
    return %c0_i32, %arg1 : i32, i32
  }
  func.func @transform_2(%arg0: i32, %arg1: i32) -> (i32, i32) {
    %c0_i32 = arith.constant 0 : i32
    %c0_i32_0 = arith.constant 0 : i32
    return %c0_i32, %arg1 : i32, i32
  }
  func.func @transform_3(%arg0: i32, %arg1: i32) -> (i32, i32) {
    %c0_i32 = arith.constant 0 : i32
    %c0_i32_0 = arith.constant 0 : i32
    return %c0_i32, %arg1 : i32, i32
  }
  func.func @transform_4(%arg0: i32, %arg1: i32) -> (i32, i32) {
    %c0_i32 = arith.constant 0 : i32
    return %arg0, %arg1 : i32, i32
  }
}

module attributes {stable_mosaic.version = 11 : i64} {
  func.func @_matmul_bn_kernel(%arg0: i32, %arg1: i32, %arg2: memref<64x128xbf16, #tpu.memory_space<vmem>>, %arg3: memref<128x128xbf16, #tpu.memory_space<vmem>>, %arg4: memref<1x128xf32, #tpu.memory_space<vmem>>, %arg5: memref<1x128xf32, #tpu.memory_space<vmem>>, %arg6: memref<64x128xbf16, #tpu.memory_space<vmem>>, %arg7: memref<64x128xbf16, #tpu.memory_space<vmem>>) attributes {dimension_semantics = [#tpu.dimension_semantics<parallel>, #tpu.dimension_semantics<parallel>], iteration_bounds = array<i64: 2, 1>, scalar_prefetch = 0 : i64, scratch_operands = 0 : i64, tpu.core_type = #tpu.core_type<tc>, window_params = [{transform_indices = @transform_0, window_bounds = array<i64: 64, 128>}, {transform_indices = @transform_1, window_bounds = array<i64: 128, 128>}, {transform_indices = @transform_2, window_bounds = array<i64: 1, 128>}, {transform_indices = @transform_3, window_bounds = array<i64: 1, 128>}, {transform_indices = @transform_4, window_bounds = array<i64: 64, 128>}, {transform_indices = @transform_5, window_bounds = array<i64: 64, 128>}]} {
    %c0 = arith.constant 0 : index
    %c0_0 = arith.constant 0 : index
    %0 = vector.load %arg2[%c0, %c0_0] : memref<64x128xbf16, #tpu.memory_space<vmem>>, vector<64x128xbf16>
    %c0_1 = arith.constant 0 : index
    %c0_2 = arith.constant 0 : index
    %1 = vector.load %arg3[%c0_1, %c0_2] : memref<128x128xbf16, #tpu.memory_space<vmem>>, vector<128x128xbf16>
    %cst = arith.constant dense<0.000000e+00> : vector<64x128xf32>
    %2 = tpu.matmul %0, %1, %cst {dimension_numbers = #tpu.dot_dimension_numbers<[1], [0], [0], [1], [0, 0, 1, 1], [], []>} : vector<64x128xbf16>, vector<128x128xbf16>, vector<64x128xf32> -> vector<64x128xf32>
    %c0_3 = arith.constant 0 : index
    %c0_4 = arith.constant 0 : index
    %3 = vector.load %arg4[%c0_3, %c0_4] : memref<1x128xf32, #tpu.memory_space<vmem>>, vector<1x128xf32>
    %4 = vector.broadcast %3 : vector<1x128xf32> to vector<64x128xf32>
    %5 = arith.mulf %2, %4 : vector<64x128xf32>
    %c0_5 = arith.constant 0 : index
    %c0_6 = arith.constant 0 : index
    %6 = vector.load %arg5[%c0_5, %c0_6] : memref<1x128xf32, #tpu.memory_space<vmem>>, vector<1x128xf32>
    %7 = vector.broadcast %6 : vector<1x128xf32> to vector<64x128xf32>
    %8 = arith.addf %5, %7 : vector<64x128xf32>
    %c0_7 = arith.constant 0 : index
    %c0_8 = arith.constant 0 : index
    %9 = vector.load %arg6[%c0_7, %c0_8] : memref<64x128xbf16, #tpu.memory_space<vmem>>, vector<64x128xbf16>
    %10 = arith.extf %9 : vector<64x128xbf16> to vector<64x128xf32>
    %11 = arith.addf %8, %10 : vector<64x128xf32>
    %cst_9 = arith.constant 0.000000e+00 : f32
    %12 = vector.broadcast %cst_9 : f32 to vector<64x128xf32>
    %13 = arith.maximumf %11, %12 : vector<64x128xf32>
    %14 = arith.truncf %13 : vector<64x128xf32> to vector<64x128xbf16>
    %c0_10 = arith.constant 0 : index
    %c0_11 = arith.constant 0 : index
    %15 = vector.load %arg7[%c0_10, %c0_11] : memref<64x128xbf16, #tpu.memory_space<vmem>>, vector<64x128xbf16>
    tpu.vector_store %arg7[%c0_10, %c0_11], %14 {strides = array<i32>} : memref<64x128xbf16, #tpu.memory_space<vmem>>, vector<64x128xbf16>,
    return
  }
  func.func @transform_0(%arg0: i32, %arg1: i32) -> (i32, i32) {
    %c0_i32 = arith.constant 0 : i32
    %c0_i32_0 = arith.constant 0 : i32
    return %arg0, %c0_i32 : i32, i32
  }
  func.func @transform_1(%arg0: i32, %arg1: i32) -> (i32, i32) {
    %c0_i32 = arith.constant 0 : i32
    %c0_i32_0 = arith.constant 0 : i32
    return %c0_i32, %arg1 : i32, i32
  }
  func.func @transform_2(%arg0: i32, %arg1: i32) -> (i32, i32) {
    %c0_i32 = arith.constant 0 : i32
    %c0_i32_0 = arith.constant 0 : i32
    return %c0_i32, %arg1 : i32, i32
  }
  func.func @transform_3(%arg0: i32, %arg1: i32) -> (i32, i32) {
    %c0_i32 = arith.constant 0 : i32
    %c0_i32_0 = arith.constant 0 : i32
    return %c0_i32, %arg1 : i32, i32
  }
  func.func @transform_4(%arg0: i32, %arg1: i32) -> (i32, i32) {
    %c0_i32 = arith.constant 0 : i32
    return %arg0, %arg1 : i32, i32
  }
  func.func @transform_5(%arg0: i32, %arg1: i32) -> (i32, i32) {
    %c0_i32 = arith.constant 0 : i32
    return %arg0, %arg1 : i32, i32
  }
}

</mosaic_0001>

<bundles_post_ra>
// kernel: bottleneck_forward.4
= control target key start
LH: loop header
LB: loop body
LE: loop exit
PB: predicated region body
PF: predicated region fallthrough
CT: control target
= control target key end

     0   :  { %s1143_s15 = smov 0   ;;  %s1145_s16 = smov 0   ;;  %s1321_s0 = inlined_call_operand.vmem [shape: bf16[512,64], index: 0, kind: input, shape index: {}]   ;;  %s1322_s1 = inlined_call_operand.vmem [shape: bf16[64,128], index: 1, kind: input, shape index: {}]   ;;  %s1323_s2 = inlined_call_operand.vmem [shape: f32[1,128], index: 2, kind: input, shape index: {}]   ;;  %s1324_s3 = inlined_call_operand.vmem [shape: f32[1,128], index: 3, kind: input, shape index: {}]   ;;  %s1325_s4 = inlined_call_operand.vmem [shape: bf16[512,128], index: 4, kind: output, shape index: {}]  }
   0x1   :  { %s1147_s17 = smov 0  }
   0x2 LB: > { %s26_s18 = sadd.s32 1, %s1112_s16  ;;  %p838_p0 = scmp.ge.s32.totalorder %s1116_s17, 1  ;;  %s1116_s17 = sphi %s1147_s17, %s14_s17   ;;  %s1112_s16 = sphi %s1145_s16, %s1327_s16   ;;  %s1108_s15 = sphi %s1143_s15, %s1326_s15  }
   0x3   : > { %p28_p1 = scmp.ge.s32.totalorder %s26_s18, 2  ;;  %p202_p2 = scmp.lt.s32.totalorder %s1116_s17, 3 }
   0x5   : > { %s1329_s18 = smov (%p28_p1, %s26_s18), 0  ;;  %p203_p3 = pnand %p838_p0, %p202_p2 }
   0x6   : > { %s839_s21 = sshll.u32 (!%p203_p3), %s1108_s15, 5 }
   0x7   : > { %206 = sbr.rel (%p203_p3) target bundleno = 227 (0xe3), region = 36  ;;  %p242_p4 = scmp.lt.s32.totalorder (!%p203_p3), %s839_s21, 63 }
   0xc   : > { %v960_v0 = vld [vmem:[%s1322_s1 + $0x18] sm:$0xff]  ;;  %v959_v1 = vld [vmem:[%s1322_s1 + $0x10] sm:$0xff]  ;;  %s1331_s21 = smov (!%p242_p4, %s839_s21), 63  ;;  %v958_v2 = vld [vmem:[%s1322_s1 + $0x8] sm:$0xff]  ;;  %vm411_vm0 = vcmask 523264  }
   0xd   : > { %464 = vmatpush.bf16.msra.mxu0 %v960_v0  ;;  %1056 = vmatpush.bf16.msra.mxu1 %v960_v0  ;;  %s840_s26 = sshll.u32 %s1331_s21, 2  ;;  %v957_v3 = vld [vmem:[%s1322_s1] sm:$0xff] }
   0xe   : > { %1057 = vmatpush.bf16.msra.mxu2 %v960_v0  ;;  %1058 = vmatpush.bf16.msra.mxu3 %v960_v0  ;;  %s1181_s5 = scalar_lea.vmem %s1321_s0, %s840_s26  ;;  %v1218_v22 = vld [vmem:[%s1323_s2] ss:$0 sm:$0xff]  ;;  %s1240_s12 = scalar_lea.vmem %s1325_s4, %s840_s26 }
   0xf   : > { %v941_v4 = vld [vmem:[%s1181_s5] sm:$0xff]  ;;  %v942_v8 = vld [vmem:[%s1181_s5 + $0x8] sm:$0xff]  ;;  %v943_v12 = vld [vmem:[%s1181_s5 + $0x10] sm:$0xff] }
  0x10   : > { %v945_v5 = vld [vmem:[%s1181_s5 + $0x20] sm:$0xff]  ;;  %v946_v9 = vld [vmem:[%s1181_s5 + $0x28] sm:$0xff]  ;;  %v947_v13 = vld [vmem:[%s1181_s5 + $0x30] sm:$0xff] }
  0x11   : > { %465 = vmatpush.bf16.msra.mxu0 %v959_v1  ;;  %1059 = vmatpush.bf16.msra.mxu1 %v959_v1  ;;  %v949_v6 = vld [vmem:[%s1181_s5 + $0x40] sm:$0xff]  ;;  %v950_v10 = vld [vmem:[%s1181_s5 + $0x48] sm:$0xff]  ;;  %v951_v14 = vld [vmem:[%s1181_s5 + $0x50] sm:$0xff] }
  0x12   : > { %1060 = vmatpush.bf16.msra.mxu2 %v959_v1  ;;  %1061 = vmatpush.bf16.msra.mxu3 %v959_v1  ;;  %v953_v7 = vld [vmem:[%s1181_s5 + $0x60] sm:$0xff]  ;;  %v954_v11 = vld [vmem:[%s1181_s5 + $0x68] sm:$0xff]  ;;  %v955_v15 = vld [vmem:[%s1181_s5 + $0x70] sm:$0xff] }
  0x13   : > { %v944_v16 = vld [vmem:[%s1181_s5 + $0x18] sm:$0xff]  ;;  %v1224_v24 = vld [vmem:[%s1324_s3] ss:$0 sm:$0xff] }
  0x14   : > { %v948_v17 = vld [vmem:[%s1181_s5 + $0x38] sm:$0xff] }
  0x15   : > { %466 = vmatpush.bf16.msra.mxu0 %v958_v2  ;;  %1062 = vmatpush.bf16.msra.mxu1 %v958_v2  ;;  %v952_v18 = vld [vmem:[%s1181_s5 + $0x58] sm:$0xff] }
  0x16   : > { %1063 = vmatpush.bf16.msra.mxu2 %v958_v2  ;;  %1064 = vmatpush.bf16.msra.mxu3 %v958_v2  ;;  %v956_v19 = vld [vmem:[%s1181_s5 + $0x78] sm:$0xff] }
  0x19   : > { %467 = vmatpush.bf16.msra.mxu0 %v957_v3  ;;  %1065 = vmatpush.bf16.msra.mxu1 %v957_v3 }
  0x1a   : > { %1066 = vmatpush.bf16.msra.mxu2 %v957_v3  ;;  %1067 = vmatpush.bf16.msra.mxu3 %v957_v3 }
  0x1c   : > { %923 = vmatmul.msk.bf16.vlgmr.msra.gmra.mxu0 %vm411_vm0, %v941_v4  ;;  %927 = vmatmul.msk.bf16.vlgmr.msra.gmra.mxu1 %vm411_vm0, %v945_v5 }
  0x1d   : > { %931 = vmatmul.msk.bf16.vlgmr.msra.gmra.mxu2 %vm411_vm0, %v949_v6  ;;  %935 = vmatmul.msk.bf16.vlgmr.msra.gmra.mxu3 %vm411_vm0, %v953_v7 }
  0x2c   : > { %924 = vmatmul.msk.bf16.gmra.mxu0 %vm411_vm0, %v942_v8  ;;  %928 = vmatmul.msk.bf16.gmra.mxu1 %vm411_vm0, %v946_v9 }
  0x2d   : > { %932 = vmatmul.msk.bf16.gmra.mxu2 %vm411_vm0, %v950_v10  ;;  %936 = vmatmul.msk.bf16.gmra.mxu3 %vm411_vm0, %v954_v11 }
  0x3c   : > { %925 = vmatmul.msk.bf16.gmra.mxu0 %vm411_vm0, %v943_v12  ;;  %929 = vmatmul.msk.bf16.gmra.mxu1 %vm411_vm0, %v947_v13 }
  0x3d   : > { %933 = vmatmul.msk.bf16.gmra.mxu2 %vm411_vm0, %v951_v14  ;;  %937 = vmatmul.msk.bf16.gmra.mxu3 %vm411_vm0, %v955_v15 }
  0x4c   : > { %926 = vmatmul.msk.bf16.gmra.mxu0 %vm411_vm0, %v944_v16  ;;  %930 = vmatmul.msk.bf16.gmra.mxu1 %vm411_vm0, %v948_v17 }
  0x4d   : > { %934 = vmatmul.msk.bf16.gmra.mxu2 %vm411_vm0, %v952_v18  ;;  %938 = vmatmul.msk.bf16.gmra.mxu3 %vm411_vm0, %v956_v19 }
  0x99   : > { %v469_v20 = vpop.f32.mrf.mxu0  ;;  %v489_v21 = vpop.f32.mrf.mxu1 }
  0x9a   : > { %v553_v23 = vmul.f32 %v1218_v22, %v469_v20  ;;  %v561_v25 = vmul.f32 %v1218_v22, %v489_v21 }
  0x9c   : > { %v589_v30 = vadd.f32 %v1224_v24, %v553_v23  ;;  %v597_v31 = vadd.f32 %v1224_v24, %v561_v25 }
  0x9e   : > { %v621_v38 = vmax.f32 %v589_v30, 0.0  ;;  %v629_v39 = vmax.f32 %v597_v31, 0.0 }
  0xa0   : > { %v509_v26 = vpop.f32.mrf.mxu2  ;;  %v529_v27 = vpop.f32.mrf.mxu3 }
  0xa1   : > { %v471_v28 = vpop.f32.mrf.mxu0  ;;  %v491_v29 = vpop.f32.mrf.mxu1  ;;  %v569_v36 = vmul.f32 %v1218_v22, %v509_v26  ;;  %v577_v37 = vmul.f32 %v1218_v22, %v529_v27 }
  0xa2   : > { %v554_v32 = vmul.f32 %v1218_v22, %v471_v28  ;;  %v562_v33 = vmul.f32 %v1218_v22, %v491_v29 }
  0xa3   : > { %v605_v46 = vadd.f32 %v1224_v24, %v569_v36  ;;  %v613_v47 = vadd.f32 %v1224_v24, %v577_v37 }
  0xa4   : > { %v590_v34 = vadd.f32 %v1224_v24, %v554_v32  ;;  %v598_v35 = vadd.f32 %v1224_v24, %v562_v33 }
  0xa5   : > { %v637_v54 = vmax.f32 %v605_v46, 0.0  ;;  %v645_v55 = vmax.f32 %v613_v47, 0.0 }
  0xa6   : > { %v622_v40 = vmax.f32 %v590_v34, 0.0  ;;  %v630_v41 = vmax.f32 %v598_v35, 0.0 }
  0xa8   : > { %v964_v42 = vpack.c.bf16 %v622_v40, %v621_v38  ;;  %v984_v43 = vpack.c.bf16 %v630_v41, %v629_v39  ;;  %v511_v44 = vpop.f32.mrf.mxu2  ;;  %v531_v45 = vpop.f32.mrf.mxu3 }
  0xa9   : > { %v570_v48 = vmul.f32 %v1218_v22, %v511_v44  ;;  %v578_v49 = vmul.f32 %v1218_v22, %v531_v45  ;;  %v474_v50 = vpop.f32.mrf.mxu0  ;;  %v494_v51 = vpop.f32.mrf.mxu1 }
  0xaa   : > { %965 = vst [vmem:[%s1240_s12] sm:$0xff] %v964_v42   ;;  %v555_v58 = vmul.f32 %v1218_v22, %v474_v50  ;;  %v563_v59 = vmul.f32 %v1218_v22, %v494_v51 }
  0xab   : > { %1044 = vst [vmem:[%s1240_s12 + $0x20] sm:$0xff] %v984_v43   ;;  %v606_v52 = vadd.f32 %v1224_v24, %v570_v48  ;;  %v614_v53 = vadd.f32 %v1224_v24, %v578_v49 }
  0xac   : > { %v591_v2 = vadd.f32 %v1224_v24, %v555_v58  ;;  %v599_v3 = vadd.f32 %v1224_v24, %v563_v59 }
  0xad   : > { %v638_v56 = vmax.f32 %v606_v52, 0.0  ;;  %v646_v57 = vmax.f32 %v614_v53, 0.0 }
  0xae   : > { %v623_v10 = vmax.f32 %v591_v2, 0.0  ;;  %v631_v11 = vmax.f32 %v599_v3, 0.0 }
  0xaf   : > { %v1004_v60 = vpack.c.bf16 %v638_v56, %v637_v54  ;;  %v1024_v61 = vpack.c.bf16 %v646_v57, %v645_v55 }
  0xb0   : > { %v514_v62 = vpop.f32.mrf.mxu2  ;;  %v534_v63 = vpop.f32.mrf.mxu3 }
  0xb1   : > { %1048 = vst [vmem:[%s1240_s12 + $0x40] sm:$0xff] %v1004_v60   ;;  %v476_v0 = vpop.f32.mrf.mxu0  ;;  %v496_v1 = vpop.f32.mrf.mxu1  ;;  %v571_v8 = vmul.f32 %v1218_v22, %v514_v62  ;;  %v579_v9 = vmul.f32 %v1218_v22, %v534_v63 }
  0xb2   : > { %1052 = vst [vmem:[%s1240_s12 + $0x60] sm:$0xff] %v1024_v61   ;;  %v556_v4 = vmul.f32 %v1218_v22, %v476_v0  ;;  %v564_v5 = vmul.f32 %v1218_v22, %v496_v1 }
  0xb3   : > { %v607_v18 = vadd.f32 %v1224_v24, %v571_v8  ;;  %v615_v19 = vadd.f32 %v1224_v24, %v579_v9 }
  0xb4   : > { %v592_v6 = vadd.f32 %v1224_v24, %v556_v4  ;;  %v600_v7 = vadd.f32 %v1224_v24, %v564_v5 }
  0xb5   : > { %v639_v28 = vmax.f32 %v607_v18, 0.0  ;;  %v647_v29 = vmax.f32 %v615_v19, 0.0 }
  0xb6   : > { %v624_v12 = vmax.f32 %v592_v6, 0.0  ;;  %v632_v13 = vmax.f32 %v600_v7, 0.0 }
  0xb8   : > { %v969_v14 = vpack.c.bf16 %v624_v12, %v623_v10  ;;  %v989_v15 = vpack.c.bf16 %v632_v13, %v631_v11  ;;  %v516_v16 = vpop.f32.mrf.mxu2  ;;  %v536_v17 = vpop.f32.mrf.mxu3 }
  0xb9   : > { %v572_v20 = vmul.f32 %v1218_v22, %v516_v16  ;;  %v580_v21 = vmul.f32 %v1218_v22, %v536_v17  ;;  %v479_v23 = vpop.f32.mrf.mxu0  ;;  %v499_v25 = vpop.f32.mrf.mxu1 }
  0xba   : > { %1041 = vst [vmem:[%s1240_s12 + $0x8] sm:$0xff] %v969_v14   ;;  %v557_v32 = vmul.f32 %v1218_v22, %v479_v23  ;;  %v565_v33 = vmul.f32 %v1218_v22, %v499_v25 }
  0xbb   : > { %1045 = vst [vmem:[%s1240_s12 + $0x28] sm:$0xff] %v989_v15   ;;  %v608_v26 = vadd.f32 %v1224_v24, %v572_v20  ;;  %v616_v27 = vadd.f32 %v1224_v24, %v580_v21 }
  0xbc   : > { %v593_v40 = vadd.f32 %v1224_v24, %v557_v32  ;;  %v601_v41 = vadd.f32 %v1224_v24, %v565_v33 }
  0xbd   : > { %v640_v30 = vmax.f32 %v608_v26, 0.0  ;;  %v648_v31 = vmax.f32 %v616_v27, 0.0 }
  0xbe   : > { %v625_v48 = vmax.f32 %v593_v40, 0.0  ;;  %v633_v49 = vmax.f32 %v601_v41, 0.0 }
  0xbf   : > { %v1009_v34 = vpack.c.bf16 %v640_v30, %v639_v28  ;;  %v1029_v35 = vpack.c.bf16 %v648_v31, %v647_v29 }
  0xc0   : > { %v519_v36 = vpop.f32.mrf.mxu2  ;;  %v539_v37 = vpop.f32.mrf.mxu3 }
  0xc1   : > { %1049 = vst [vmem:[%s1240_s12 + $0x48] sm:$0xff] %v1009_v34   ;;  %v481_v38 = vpop.f32.mrf.mxu0  ;;  %v501_v39 = vpop.f32.mrf.mxu1  ;;  %v573_v46 = vmul.f32 %v1218_v22, %v519_v36  ;;  %v581_v47 = vmul.f32 %v1218_v22, %v539_v37 }
  0xc2   : > { %1053 = vst [vmem:[%s1240_s12 + $0x68] sm:$0xff] %v1029_v35   ;;  %v558_v42 = vmul.f32 %v1218_v22, %v481_v38  ;;  %v566_v43 = vmul.f32 %v1218_v22, %v501_v39 }
  0xc3   : > { %v609_v56 = vadd.f32 %v1224_v24, %v573_v46  ;;  %v617_v57 = vadd.f32 %v1224_v24, %v581_v47 }
  0xc4   : > { %v594_v44 = vadd.f32 %v1224_v24, %v558_v42  ;;  %v602_v45 = vadd.f32 %v1224_v24, %v566_v43 }
  0xc5   : > { %v641_v0 = vmax.f32 %v609_v56, 0.0  ;;  %v649_v1 = vmax.f32 %v617_v57, 0.0 }
  0xc6   : > { %v626_v50 = vmax.f32 %v594_v44, 0.0  ;;  %v634_v51 = vmax.f32 %v602_v45, 0.0 }
  0xc8   : > { %v974_v52 = vpack.c.bf16 %v626_v50, %v625_v48  ;;  %v994_v53 = vpack.c.bf16 %v634_v51, %v633_v49  ;;  %v521_v54 = vpop.f32.mrf.mxu2  ;;  %v541_v55 = vpop.f32.mrf.mxu3 }
  0xc9   : > { %v574_v58 = vmul.f32 %v1218_v22, %v521_v54  ;;  %v582_v59 = vmul.f32 %v1218_v22, %v541_v55  ;;  %v484_v60 = vpop.f32.mrf.mxu0  ;;  %v504_v61 = vpop.f32.mrf.mxu1 }
  0xca   : > { %1042 = vst [vmem:[%s1240_s12 + $0x10] sm:$0xff] %v974_v52   ;;  %v559_v4 = vmul.f32 %v1218_v22, %v484_v60  ;;  %v567_v5 = vmul.f32 %v1218_v22, %v504_v61 }
  0xcb   : > { %1046 = vst [vmem:[%s1240_s12 + $0x30] sm:$0xff] %v994_v53   ;;  %v610_v62 = vadd.f32 %v1224_v24, %v574_v58  ;;  %v618_v63 = vadd.f32 %v1224_v24, %v582_v59 }
  0xcc   : > { %v595_v12 = vadd.f32 %v1224_v24, %v559_v4  ;;  %v603_v13 = vadd.f32 %v1224_v24, %v567_v5 }
  0xcd   : > { %v642_v2 = vmax.f32 %v610_v62, 0.0  ;;  %v650_v3 = vmax.f32 %v618_v63, 0.0 }
  0xce   : > { %v627_v20 = vmax.f32 %v595_v12, 0.0  ;;  %v635_v21 = vmax.f32 %v603_v13, 0.0 }
  0xcf   : > { %v1014_v6 = vpack.c.bf16 %v642_v2, %v641_v0  ;;  %v1034_v7 = vpack.c.bf16 %v650_v3, %v649_v1 }
  0xd0   : > { %v524_v8 = vpop.f32.mrf.mxu2  ;;  %v544_v9 = vpop.f32.mrf.mxu3 }
  0xd1   : > { %1050 = vst [vmem:[%s1240_s12 + $0x50] sm:$0xff] %v1014_v6   ;;  %v486_v10 = vpop.f32.mrf.mxu0  ;;  %v506_v11 = vpop.f32.mrf.mxu1  ;;  %v575_v18 = vmul.f32 %v1218_v22, %v524_v8  ;;  %v583_v19 = vmul.f32 %v1218_v22, %v544_v9 }
  0xd2   : > { %1054 = vst [vmem:[%s1240_s12 + $0x70] sm:$0xff] %v1034_v7   ;;  %v560_v14 = vmul.f32 %v1218_v22, %v486_v10  ;;  %v568_v15 = vmul.f32 %v1218_v22, %v506_v11 }
  0xd3   : > { %v611_v30 = vadd.f32 %v1224_v24, %v575_v18  ;;  %v619_v31 = vadd.f32 %v1224_v24, %v583_v19 }
  0xd4   : > { %v596_v16 = vadd.f32 %v1224_v24, %v560_v14  ;;  %v604_v17 = vadd.f32 %v1224_v24, %v568_v15 }
  0xd5   : > { %v643_v36 = vmax.f32 %v611_v30, 0.0  ;;  %v651_v37 = vmax.f32 %v619_v31, 0.0 }
  0xd6   : > { %v628_v23 = vmax.f32 %v596_v16, 0.0  ;;  %v636_v25 = vmax.f32 %v604_v17, 0.0 }
  0xd8   : > { %v979_v26 = vpack.c.bf16 %v628_v23, %v627_v20  ;;  %v999_v27 = vpack.c.bf16 %v636_v25, %v635_v21  ;;  %v526_v28 = vpop.f32.mrf.mxu2  ;;  %v546_v29 = vpop.f32.mrf.mxu3 }
  0xd9   : > { %v576_v32 = vmul.f32 %v1218_v22, %v526_v28  ;;  %v584_v33 = vmul.f32 %v1218_v22, %v546_v29 }
  0xda   : > { %1043 = vst [vmem:[%s1240_s12 + $0x18] sm:$0xff] %v979_v26  }
  0xdb   : > { %1047 = vst [vmem:[%s1240_s12 + $0x38] sm:$0xff] %v999_v27   ;;  %v612_v34 = vadd.f32 %v1224_v24, %v576_v32  ;;  %v620_v35 = vadd.f32 %v1224_v24, %v584_v33 }
  0xdd   : > { %v644_v38 = vmax.f32 %v612_v34, 0.0  ;;  %v652_v39 = vmax.f32 %v620_v35, 0.0 }
  0xdf   : > { %v1019_v40 = vpack.c.bf16 %v644_v38, %v643_v36  ;;  %v1039_v41 = vpack.c.bf16 %v652_v39, %v651_v37 }
  0xe1   : > { %1051 = vst [vmem:[%s1240_s12 + $0x58] sm:$0xff] %v1019_v40  }
  0xe2   : > { %1055 = vst [vmem:[%s1240_s12 + $0x78] sm:$0xff] %v1039_v41  }
  0xe3 PF: > { %s14_s17 = sadd.s32 1, %s1116_s17   ;;  %s1326_s15 = smov %s1112_s16 }
  0xe4   : > { %p11_p5 = scmp.ge.s32.totalorder %s14_s17, 4   ;;  %s1327_s16 = smov %s1329_s18 }
  0xe6   :  { %13 = sbr.rel (!%p11_p5) target bundleno = 2 (0x2), region = 75 }

// kernel: bottleneck_forward.6
= control target key start
LH: loop header
LB: loop body
LE: loop exit
PB: predicated region body
PF: predicated region fallthrough
CT: control target
= control target key end

     0   :  { %s691_s15 = smov 0   ;;  %s693_s16 = smov 0   ;;  %s749_s0 = inlined_call_operand.vmem [shape: bf16[128,64], index: 0, kind: input, shape index: {}]   ;;  %s750_s1 = inlined_call_operand.vmem [shape: bf16[64,128], index: 1, kind: input, shape index: {}]   ;;  %s751_s2 = inlined_call_operand.vmem [shape: f32[1,128], index: 2, kind: input, shape index: {}]   ;;  %s752_s3 = inlined_call_operand.vmem [shape: f32[1,128], index: 3, kind: input, shape index: {}]   ;;  %s753_s4 = inlined_call_operand.vmem [shape: bf16[128,128], index: 4, kind: output, shape index: {}]  }
   0x1   :  { %s695_s17 = smov 0  }
   0x2 LB: > { %s26_s18 = sadd.s32 1, %s660_s16  ;;  %p530_p0 = scmp.ge.s32.totalorder %s664_s17, 1  ;;  %s664_s17 = sphi %s695_s17, %s14_s17   ;;  %s660_s16 = sphi %s693_s16, %s755_s16   ;;  %s656_s15 = sphi %s691_s15, %s754_s15  }
   0x3   : > { %p28_p1 = scmp.ge.s32.totalorder %s26_s18, 2  ;;  %p202_p2 = scmp.lt.s32.totalorder %s664_s17, 3 }
   0x5   : > { %s757_s18 = smov (%p28_p1, %s26_s18), 0  ;;  %p203_p3 = pnand %p530_p0, %p202_p2 }
   0x6   : > { %s531_s21 = sshll.u32 (!%p203_p3), %s656_s15, 3 }
   0x7   : > { %206 = sbr.rel (%p203_p3) target bundleno = 177 (0xb1), region = 36  ;;  %p242_p4 = scmp.lt.s32.totalorder (!%p203_p3), %s531_s21, 15 }
   0xc   : > { %v580_v0 = vld [vmem:[%s750_s1 + $0x18] sm:$0xff]  ;;  %v579_v1 = vld [vmem:[%s750_s1 + $0x10] sm:$0xff]  ;;  %s759_s21 = smov (!%p242_p4, %s531_s21), 15  ;;  %v578_v2 = vld [vmem:[%s750_s1 + $0x8] sm:$0xff]  ;;  %vm327_vm0 = vcmask 523264  }
   0xd   : > { %344 = vmatpush.bf16.msra.mxu0 %v580_v0  ;;  %604 = vmatpush.bf16.msra.mxu1 %v580_v0  ;;  %s532_s26 = sshll.u32 %s759_s21, 2  ;;  %v577_v3 = vld [vmem:[%s750_s1] sm:$0xff] }
   0xe   : > { %605 = vmatpush.bf16.msra.mxu2 %v580_v0  ;;  %606 = vmatpush.bf16.msra.mxu3 %v580_v0  ;;  %s245_s5 = scalar_lea.vmem %s749_s0, %s532_s26  ;;  %v640_v10 = vld [vmem:[%s751_s2] ss:$0 sm:$0xff]  ;;  %s264_s12 = scalar_lea.vmem %s753_s4, %s532_s26 }
   0xf   : > { %v573_v4 = vld [vmem:[%s245_s5] sm:$0xff]  ;;  %v574_v5 = vld [vmem:[%s245_s5 + $0x8] sm:$0xff]  ;;  %v575_v6 = vld [vmem:[%s245_s5 + $0x10] sm:$0xff] }
  0x10   : > { %v576_v7 = vld [vmem:[%s245_s5 + $0x18] sm:$0xff]  ;;  %v641_v12 = vld [vmem:[%s752_s3] ss:$0 sm:$0xff] }
  0x11   : > { %345 = vmatpush.bf16.msra.mxu0 %v579_v1  ;;  %607 = vmatpush.bf16.msra.mxu1 %v579_v1 }
  0x12   : > { %608 = vmatpush.bf16.msra.mxu2 %v579_v1  ;;  %609 = vmatpush.bf16.msra.mxu3 %v579_v1 }
  0x15   : > { %346 = vmatpush.bf16.msra.mxu0 %v578_v2  ;;  %610 = vmatpush.bf16.msra.mxu1 %v578_v2 }
  0x16   : > { %611 = vmatpush.bf16.msra.mxu2 %v578_v2  ;;  %612 = vmatpush.bf16.msra.mxu3 %v578_v2 }
  0x19   : > { %347 = vmatpush.bf16.msra.mxu0 %v577_v3  ;;  %613 = vmatpush.bf16.msra.mxu1 %v577_v3 }
  0x1a   : > { %614 = vmatpush.bf16.msra.mxu2 %v577_v3  ;;  %615 = vmatpush.bf16.msra.mxu3 %v577_v3 }
  0x1c   : > { %567 = vmatmul.msk.bf16.vlgmr.msra.gmra.mxu0 %vm327_vm0, %v573_v4  ;;  %568 = vmatmul.msk.bf16.vlgmr.msra.gmra.mxu1 %vm327_vm0, %v574_v5 }
  0x1d   : > { %569 = vmatmul.msk.bf16.vlgmr.msra.gmra.mxu2 %vm327_vm0, %v575_v6  ;;  %570 = vmatmul.msk.bf16.vlgmr.msra.gmra.mxu3 %vm327_vm0, %v576_v7 }
  0x99   : > { %v349_v8 = vpop.f32.mrf.mxu0  ;;  %v354_v9 = vpop.f32.mrf.mxu1 }
  0x9a   : > { %v373_v11 = vmul.f32 %v640_v10, %v349_v8  ;;  %v375_v13 = vmul.f32 %v640_v10, %v354_v9 }
  0x9c   : > { %v385_v20 = vadd.f32 %v641_v12, %v373_v11  ;;  %v387_v21 = vadd.f32 %v641_v12, %v375_v13 }
  0xa0   : > { %v359_v14 = vpop.f32.mrf.mxu2  ;;  %v364_v15 = vpop.f32.mrf.mxu3 }
  0xa1   : > { %v351_v16 = vpop.f32.mrf.mxu0  ;;  %v356_v17 = vpop.f32.mrf.mxu1  ;;  %v377_v26 = vmul.f32 %v640_v10, %v359_v14  ;;  %v379_v27 = vmul.f32 %v640_v10, %v364_v15 }
  0xa2   : > { %v374_v18 = vmul.f32 %v640_v10, %v351_v16  ;;  %v376_v19 = vmul.f32 %v640_v10, %v356_v17 }
  0xa3   : > { %v389_v32 = vadd.f32 %v641_v12, %v377_v26  ;;  %v391_v33 = vadd.f32 %v641_v12, %v379_v27 }
  0xa4   : > { %v386_v22 = vadd.f32 %v641_v12, %v374_v18  ;;  %v388_v23 = vadd.f32 %v641_v12, %v376_v19 }
  0xa6   : > { %v584_v24 = vpack.c.bf16 %v386_v22, %v385_v20  ;;  %v589_v25 = vpack.c.bf16 %v388_v23, %v387_v21 }
  0xa8   : > { %585 = vst [vmem:[%s264_s12] sm:$0xff] %v584_v24   ;;  %v361_v28 = vpop.f32.mrf.mxu2  ;;  %v366_v29 = vpop.f32.mrf.mxu3 }
  0xa9   : > { %601 = vst [vmem:[%s264_s12 + $0x8] sm:$0xff] %v589_v25   ;;  %v378_v30 = vmul.f32 %v640_v10, %v361_v28  ;;  %v380_v31 = vmul.f32 %v640_v10, %v366_v29 }
  0xab   : > { %v390_v34 = vadd.f32 %v641_v12, %v378_v30  ;;  %v392_v35 = vadd.f32 %v641_v12, %v380_v31 }
  0xad   : > { %v594_v36 = vpack.c.bf16 %v390_v34, %v389_v32  ;;  %v599_v37 = vpack.c.bf16 %v392_v35, %v391_v33 }
  0xaf   : > { %602 = vst [vmem:[%s264_s12 + $0x10] sm:$0xff] %v594_v36  }
  0xb0   : > { %603 = vst [vmem:[%s264_s12 + $0x18] sm:$0xff] %v599_v37  }
  0xb1 PF: > { %s14_s17 = sadd.s32 1, %s664_s17   ;;  %s754_s15 = smov %s660_s16 }
  0xb2   : > { %p11_p5 = scmp.ge.s32.totalorder %s14_s17, 4   ;;  %s755_s16 = smov %s757_s18 }
  0xb4   :  { %13 = sbr.rel (!%p11_p5) target bundleno = 2 (0x2), region = 75 }

// kernel: bottleneck_forward.7
= control target key start
LH: loop header
LB: loop body
LE: loop exit
PB: predicated region body
PF: predicated region fallthrough
CT: control target
= control target key end

     0   :  { %s874_s18 = smov 0   ;;  %s876_s19 = smov 0   ;;  %s948_s0 = inlined_call_operand.vmem [shape: bf16[128,128], index: 0, kind: input, shape index: {}]   ;;  %s949_s1 = inlined_call_operand.vmem [shape: bf16[128,128], index: 1, kind: input, shape index: {}]   ;;  %s950_s2 = inlined_call_operand.vmem [shape: f32[1,128], index: 2, kind: input, shape index: {}]   ;;  %s951_s3 = inlined_call_operand.vmem [shape: f32[1,128], index: 3, kind: input, shape index: {}]   ;;  %s952_s4 = inlined_call_operand.vmem [shape: bf16[128,128], index: 4, kind: input, shape index: {}]   ;;  %s953_s5 = inlined_call_operand.vmem [shape: bf16[128,128], index: 5, kind: output, shape index: {}]  }
   0x1   :  { %s878_s20 = smov 0  }
   0x2 LB: > { %s27_s21 = sadd.s32 1, %s838_s19  ;;  %p659_p0 = scmp.ge.s32.totalorder %s842_s20, 1  ;;  %s842_s20 = sphi %s878_s20, %s15_s20   ;;  %s838_s19 = sphi %s876_s19, %s955_s19   ;;  %s834_s18 = sphi %s874_s18, %s954_s18  }
   0x3   : > { %p29_p1 = scmp.ge.s32.totalorder %s27_s21, 2  ;;  %p243_p2 = scmp.lt.s32.totalorder %s842_s20, 3 }
   0x5   : > { %s957_s21 = smov (%p29_p1, %s27_s21), 0  ;;  %p244_p3 = pnand %p659_p0, %p243_p2 }
   0x6   : > { %s660_s30 = sshll.u32 (!%p244_p3), %s834_s18, 3 }
   0x7   : > { %247 = sbr.rel (%p244_p3) target bundleno = 197 (0xc5), region = 40  ;;  %p293_p4 = scmp.lt.s32.totalorder (!%p244_p3), %s660_s30, 15 }
   0xc   : > { %v727_v0 = vld [vmem:[%s949_s1 + $0x38] sm:$0xff]  ;;  %v726_v1 = vld [vmem:[%s949_s1 + $0x30] sm:$0xff]  ;;  %v725_v2 = vld [vmem:[%s949_s1 + $0x28] sm:$0xff]  ;;  %s959_s30 = smov (!%p293_p4, %s660_s30), 15 }
   0xd   : > { %422 = vmatpush.bf16.msra.mxu0 %v727_v0  ;;  %770 = vmatpush.bf16.msra.mxu1 %v727_v0  ;;  %v724_v3 = vld [vmem:[%s949_s1 + $0x20] sm:$0xff]  ;;  %v723_v4 = vld [vmem:[%s949_s1 + $0x18] sm:$0xff]  ;;  %v722_v5 = vld [vmem:[%s949_s1 + $0x10] sm:$0xff]  ;;  %s916_s12 = sshll.u32 %s959_s30, 2 }
   0xe   : > { %771 = vmatpush.bf16.msra.mxu2 %v727_v0  ;;  %772 = vmatpush.bf16.msra.mxu3 %v727_v0  ;;  %v721_v6 = vld [vmem:[%s949_s1 + $0x8] sm:$0xff]  ;;  %v720_v7 = vld [vmem:[%s949_s1] sm:$0xff]  ;;  %s296_s17 = scalar_lea.vmem %s948_s0, %s916_s12  ;;  %s315_s25 = scalar_lea.vmem %s952_s4, %s916_s12 }
   0xf   : > { %v716_v8 = vld [vmem:[%s296_s17] sm:$0xff]  ;;  %v717_v9 = vld [vmem:[%s296_s17 + $0x8] sm:$0xff]  ;;  %v718_v10 = vld [vmem:[%s296_s17 + $0x10] sm:$0xff]  ;;  %s324_s30 = scalar_lea.vmem %s953_s5, %s916_s12 }
  0x10   : > { %v719_v11 = vld [vmem:[%s296_s17 + $0x18] sm:$0xff]  ;;  %v818_v12 = vld [vmem:[%s950_s2] ss:$0 sm:$0xff]  ;;  %v764_v19 = vld [vmem:[%s315_s25 + $0x8] sm:$0xff]  }
  0x11   : > { %423 = vmatpush.bf16.msra.mxu0 %v726_v1  ;;  %773 = vmatpush.bf16.msra.mxu1 %v726_v1  ;;  %v819_v16 = vld [vmem:[%s951_s3] ss:$0 sm:$0xff]  ;;  %v734_v23 = vunpack.c.l.bf16 %v764_v19  ;;  %v735_v31 = vunpack.c.h.bf16 %v764_v19  ;;  %v765_v36 = vld [vmem:[%s315_s25 + $0x10] sm:$0xff]   ;;  %v766_v37 = vld [vmem:[%s315_s25 + $0x18] sm:$0xff]  }
  0x12   : > { %774 = vmatpush.bf16.msra.mxu2 %v726_v1  ;;  %775 = vmatpush.bf16.msra.mxu3 %v726_v1  ;;  %v729_v18 = vld [vmem:[%s315_s25] sm:$0xff]   ;;  %v738_v43 = vunpack.c.l.bf16 %v765_v36  ;;  %v742_v45 = vunpack.c.l.bf16 %v766_v37  ;;  %v739_v53 = vunpack.c.h.bf16 %v765_v36  ;;  %v743_v55 = vunpack.c.h.bf16 %v766_v37 }
  0x13   : > { %v730_v21 = vunpack.c.l.bf16 %v729_v18  ;;  %v731_v29 = vunpack.c.h.bf16 %v729_v18 }
  0x15   : > { %424 = vmatpush.bf16.msra.mxu0 %v725_v2  ;;  %776 = vmatpush.bf16.msra.mxu1 %v725_v2 }
  0x16   : > { %777 = vmatpush.bf16.msra.mxu2 %v725_v2  ;;  %778 = vmatpush.bf16.msra.mxu3 %v725_v2 }
  0x19   : > { %425 = vmatpush.bf16.msra.mxu0 %v724_v3  ;;  %779 = vmatpush.bf16.msra.mxu1 %v724_v3 }
  0x1a   : > { %780 = vmatpush.bf16.msra.mxu2 %v724_v3  ;;  %781 = vmatpush.bf16.msra.mxu3 %v724_v3 }
  0x1d   : > { %426 = vmatpush.bf16.msra.mxu0 %v723_v4  ;;  %782 = vmatpush.bf16.msra.mxu1 %v723_v4 }
  0x1e   : > { %783 = vmatpush.bf16.msra.mxu2 %v723_v4  ;;  %784 = vmatpush.bf16.msra.mxu3 %v723_v4 }
  0x21   : > { %427 = vmatpush.bf16.msra.mxu0 %v722_v5  ;;  %785 = vmatpush.bf16.msra.mxu1 %v722_v5 }
  0x22   : > { %786 = vmatpush.bf16.msra.mxu2 %v722_v5  ;;  %787 = vmatpush.bf16.msra.mxu3 %v722_v5 }
  0x25   : > { %428 = vmatpush.bf16.msra.mxu0 %v721_v6  ;;  %788 = vmatpush.bf16.msra.mxu1 %v721_v6 }
  0x26   : > { %789 = vmatpush.bf16.msra.mxu2 %v721_v6  ;;  %790 = vmatpush.bf16.msra.mxu3 %v721_v6 }
  0x29   : > { %429 = vmatpush.bf16.msra.mxu0 %v720_v7  ;;  %791 = vmatpush.bf16.msra.mxu1 %v720_v7 }
  0x2a   : > { %792 = vmatpush.bf16.msra.mxu2 %v720_v7  ;;  %793 = vmatpush.bf16.msra.mxu3 %v720_v7 }
  0x2c   : > { %430 = vmatmul.bf16.vlgmr.msra.gmra.mxu0 %v716_v8  ;;  %435 = vmatmul.bf16.vlgmr.msra.gmra.mxu1 %v717_v9 }
  0x2d   : > { %440 = vmatmul.bf16.vlgmr.msra.gmra.mxu2 %v718_v10  ;;  %445 = vmatmul.bf16.vlgmr.msra.gmra.mxu3 %v719_v11 }
  0xa9   : > { %v431_v13 = vpop.f32.mrf.mxu0  ;;  %v436_v14 = vpop.f32.mrf.mxu1 }
  0xaa   : > { %v455_v15 = vmul.f32 %v818_v12, %v431_v13  ;;  %v457_v17 = vmul.f32 %v818_v12, %v436_v14 }
  0xac   : > { %v467_v20 = vadd.f32 %v819_v16, %v455_v15  ;;  %v469_v22 = vadd.f32 %v819_v16, %v457_v17 }
  0xae   : > { %v491_v34 = vadd.f32 %v730_v21, %v467_v20  ;;  %v493_v35 = vadd.f32 %v734_v23, %v469_v22 }
  0xb0   : > { %v441_v24 = vpop.f32.mrf.mxu2  ;;  %v446_v25 = vpop.f32.mrf.mxu3  ;;  %v499_v46 = vmax.f32 %v491_v34, 0.0  ;;  %v501_v47 = vmax.f32 %v493_v35, 0.0 }
  0xb1   : > { %v433_v26 = vpop.f32.mrf.mxu0  ;;  %v438_v27 = vpop.f32.mrf.mxu1  ;;  %v459_v32 = vmul.f32 %v818_v12, %v441_v24  ;;  %v461_v33 = vmul.f32 %v818_v12, %v446_v25 }
  0xb2   : > { %v456_v28 = vmul.f32 %v818_v12, %v433_v26  ;;  %v458_v30 = vmul.f32 %v818_v12, %v438_v27 }
  0xb3   : > { %v471_v42 = vadd.f32 %v819_v16, %v459_v32  ;;  %v473_v44 = vadd.f32 %v819_v16, %v461_v33 }
  0xb4   : > { %v468_v38 = vadd.f32 %v819_v16, %v456_v28  ;;  %v470_v39 = vadd.f32 %v819_v16, %v458_v30 }
  0xb5   : > { %v495_v58 = vadd.f32 %v738_v43, %v471_v42  ;;  %v497_v59 = vadd.f32 %v742_v45, %v473_v44 }
  0xb6   : > { %v492_v40 = vadd.f32 %v731_v29, %v468_v38  ;;  %v494_v41 = vadd.f32 %v735_v31, %v470_v39 }
  0xb7   : > { %v503_v0 = vmax.f32 %v495_v58, 0.0  ;;  %v505_v1 = vmax.f32 %v497_v59, 0.0 }
  0xb8   : > { %v500_v48 = vmax.f32 %v492_v40, 0.0  ;;  %v502_v49 = vmax.f32 %v494_v41, 0.0  ;;  %v443_v50 = vpop.f32.mrf.mxu2  ;;  %v448_v51 = vpop.f32.mrf.mxu3 }
  0xb9   : > { %v460_v52 = vmul.f32 %v818_v12, %v443_v50  ;;  %v462_v54 = vmul.f32 %v818_v12, %v448_v51 }
  0xba   : > { %v747_v56 = vpack.c.bf16 %v500_v48, %v499_v46  ;;  %v752_v57 = vpack.c.bf16 %v502_v49, %v501_v47 }
  0xbb   : > { %v472_v60 = vadd.f32 %v819_v16, %v460_v52  ;;  %v474_v61 = vadd.f32 %v819_v16, %v462_v54 }
  0xbc   : > { %748 = vst [vmem:[%s324_s30] sm:$0xff] %v747_v56  }
  0xbd   : > { %767 = vst [vmem:[%s324_s30 + $0x8] sm:$0xff] %v752_v57   ;;  %v496_v62 = vadd.f32 %v739_v53, %v472_v60  ;;  %v498_v63 = vadd.f32 %v743_v55, %v474_v61 }
  0xbf   : > { %v504_v2 = vmax.f32 %v496_v62, 0.0  ;;  %v506_v3 = vmax.f32 %v498_v63, 0.0 }
  0xc1   : > { %v757_v4 = vpack.c.bf16 %v504_v2, %v503_v0  ;;  %v762_v5 = vpack.c.bf16 %v506_v3, %v505_v1 }
  0xc3   : > { %768 = vst [vmem:[%s324_s30 + $0x10] sm:$0xff] %v757_v4  }
  0xc4   : > { %769 = vst [vmem:[%s324_s30 + $0x18] sm:$0xff] %v762_v5  }
  0xc5 PF: > { %s15_s20 = sadd.s32 1, %s842_s20   ;;  %s954_s18 = smov %s838_s19 }
  0xc6   : > { %p12_p5 = scmp.ge.s32.totalorder %s15_s20, 4   ;;  %s955_s19 = smov %s957_s21 }
  0xc8   :  { %14 = sbr.rel (!%p12_p5) target bundleno = 2 (0x2), region = 82 }

// kernel: bottleneck_forward.5
= control target key start
LH: loop header
LB: loop body
LE: loop exit
PB: predicated region body
PF: predicated region fallthrough
CT: control target
= control target key end

     0   :  { %s2693_s15 = smov 0   ;;  %s2695_s16 = smov 0   ;;  %s3147_s0 = inlined_call_operand.vmem [shape: bf16[2,9,2,9,256], index: 0, kind: input, shape index: {}]   ;;  %s3148_s1 = inlined_call_operand.vmem [shape: bf16[1152,128], index: 1, kind: input, shape index: {}]   ;;  %s3149_s2 = inlined_call_operand.vmem [shape: f32[1,128], index: 2, kind: input, shape index: {}]   ;;  %s3150_s3 = inlined_call_operand.vmem [shape: f32[1,128], index: 3, kind: input, shape index: {}]   ;;  %s3151_s4 = inlined_call_operand.vmem [shape: bf16[2,8,8,128], index: 4, kind: output, shape index: {}]  }
   0x1   :  { %s2697_s17 = smov 0  }
   0x2 LB: > { %s26_s18 = sadd.s32 1, %s2662_s16  ;;  %p1967_p0 = scmp.ge.s32.totalorder %s2666_s17, 1  ;;  %s2666_s17 = sphi %s2697_s17, %s14_s17   ;;  %s2662_s16 = sphi %s2695_s16, %s3155_s16   ;;  %s2658_s15 = sphi %s2693_s15, %s3154_s15  }
   0x3   : > { %p28_p1 = scmp.ge.s32.totalorder %s26_s18, 2  ;;  %p176_p2 = scmp.lt.s32.totalorder %s2666_s17, 3 }
   0x5   : > { %s3157_s18 = smov (%p28_p1, %s26_s18), 0  ;;  %p177_p3 = pnand %p1967_p0, %p176_p2 }
   0x6   : > { %p206_p4 = scmp.lt.s32.totalorder (!%p177_p3), %s2658_s15, 1 }
   0x7   : > { %180 = sbr.rel (%p177_p3) target bundleno = 339 (0x153), region = 36 }
   0xc   : > { %v2513_v0 = vld [vmem:[%s3148_s1 + $0x38] sm:$0xff]  ;;  %v2512_v2 = vld [vmem:[%s3148_s1 + $0x30] sm:$0xff]  ;;  %s3159_s15 = smov (!%p206_p4, %s2658_s15), 1  ;;  %v2511_v6 = vld [vmem:[%s3148_s1 + $0x28] sm:$0xff]  ;;  %vm273_vm0 = vsmask.f32 3328 }
   0xd   : > { %v2529_v1 = vld [vmem:[%s3148_s1 + $0xb8] sm:$0xff]  ;;  %2601 = vmatpush.bf16.msra.mxu1 %v2513_v0  ;;  %1563 = vmatpush.bf16.msra.mxu0 %v2513_v0  ;;  %v2528_v3 = vld [vmem:[%s3148_s1 + $0xb0] sm:$0xff]  ;;  %s2617_s29 = smul.u32 288, %s3159_s15  ;;  %v2527_v7 = vld [vmem:[%s3148_s1 + $0xa8] sm:$0xff]  ;;  %vm274_vm1 = vsmask.f32 7440 }
   0xe   : > { %1621 = vmatpush.bf16.msra.mxu2 %v2529_v1  ;;  %v2537_v4 = vld [vmem:[%s3148_s1 + $0xf8] sm:$0xff]  ;;  %v2536_v5 = vld [vmem:[%s3148_s1 + $0xf0] sm:$0xff]  ;;  %v2510_v10 = vld [vmem:[%s3148_s1 + $0x20] sm:$0xff]  ;;  %s2469_s22 = sshll.u32 %s3159_s15, 5 }
   0xf   : > { %1650 = vmatpush.bf16.msra.mxu3 %v2537_v4  ;;  %s2738_s10 = scalar_lea.vmem %s3147_s0, %s2617_s29  ;;  %v2526_v13 = vld [vmem:[%s3148_s1 + $0xa0] sm:$0xff]  ;;  %v2535_v14 = vld [vmem:[%s3148_s1 + $0xe8] sm:$0xff]  ;;  %v2509_v26 = vld [vmem:[%s3148_s1 + $0x18] sm:$0xff]  ;;  %s3111_s25 = scalar_lea.vmem %s3151_s4, %s2469_s22 }
  0x10   : > { %v229_v8 = vld [vmem:[%s2738_s10 + $0x80] sm:$0xf]  ;;  %v258_v16 = vld [vmem:[%s2738_s10 + $0x8] sm:$0x1]  ;;  %v2525_v34 = vld [vmem:[%s3148_s1 + $0x98] sm:$0xff] }
  0x11   : > { %2602 = vmatpush.bf16.msra.mxu1 %v2512_v2  ;;  %1564 = vmatpush.bf16.msra.mxu0 %v2512_v2  ;;  %v230_v9 = vld [vmem:[%s2738_s10 + $0xa0] sm:$0xf]  ;;  %237 = vst [vmem:[#allocation2 + $0x90] sm:$0xf] %v229_v8  ;;  %v260_v19 = vld [vmem:[%s2738_s10 + $0x28] sm:$0x1]  ;;  %vm2775_vm2 = vmor %vm273_vm0, %vm274_vm1 }
  0x12   : > { %1622 = vmatpush.bf16.msra.mxu2 %v2528_v3  ;;  %v225_v11 = vld [vmem:[%s2738_s10] sm:$0xff]   ;;  %238 = vst [vmem:[#allocation2 + $0xb4] sm:$0xf] %v230_v9  ;;  %v286_v21 = vshll.u32 %v258_v16, 16  ;;  %v300_v25 = vshll.u32 %v260_v19, 16  ;;  %v1971_v41 = vld [vmem:[%s2738_s10 + $0x10] sm:$0xff]  }
  0x13   : > { %v226_v12 = vld [vmem:[%s2738_s10 + $0x20] sm:$0xff]   ;;  %1651 = vmatpush.bf16.msra.mxu3 %v2536_v5  ;;  %233 = vst [vmem:[#allocation2] sm:$0xff] %v225_v11   ;;  %v2533_v42 = vld [vmem:[%s3148_s1 + $0xd8] sm:$0xff]  ;;  %v2508_v44 = vld [vmem:[%s3148_s1 + $0x10] sm:$0xff] }
  0x14   : > { %v257_v15 = vld [vmem:[%s2738_s10] sm:$0xf]  ;;  %234 = vst [vmem:[#allocation2 + $0x24] sm:$0xff] %v226_v12   ;;  %v288_v36 = vrot.slane %v286_v21, 5  ;;  %v302_v40 = vrot.slane %v300_v25, 5  ;;  %v2524_v45 = vld [vmem:[%s3148_s1 + $0x90] sm:$0xff] }
  0x15   : > { %2603 = vmatpush.bf16.msra.mxu1 %v2511_v6  ;;  %1565 = vmatpush.bf16.msra.mxu0 %v2511_v6  ;;  %v259_v17 = vld [vmem:[%s2738_s10 + $0x20] sm:$0xf]  ;;  %v277_v18 = vshrl.u32 %v257_v15, 16  ;;  %v280_v20 = vshll.u32 %v257_v15, 16  ;;  %v2532_v48 = vld [vmem:[%s3148_s1 + $0xd0] sm:$0xff]  ;;  %415 = vst [vmem:[#allocation2 + $0xc] sm:$0xff] %v1971_v41  }
  0x16   : > { %1623 = vmatpush.bf16.msra.mxu2 %v2527_v7  ;;  %v291_v22 = vshrl.u32 %v259_v17, 16  ;;  %v294_v24 = vshll.u32 %v259_v17, 16  ;;  %v2534_v27 = vld [vmem:[%s3148_s1 + $0xe0] sm:$0xff]  ;;  %v1972_v49 = vld [vmem:[%s2738_s10 + $0x30] sm:$0xff]   ;;  %v262_v52 = vld [vmem:[%s2738_s10 + $0x48] sm:$0x1] }
  0x17   : > { %v279_v23 = vrot.slane %v277_v18, 4  ;;  %1652 = vmatpush.bf16.msra.mxu3 %v2535_v14  ;;  %v282_v28 = vrot.slane %v280_v20, 5  ;;  %v231_v31 = vld [vmem:[%s2738_s10 + $0xc0] sm:$0xf]  ;;  %v264_v54 = vld [vmem:[%s2738_s10 + $0x68] sm:$0x1] }
  0x18   : > { %v293_v29 = vrot.slane %v291_v22, 4  ;;  %v296_v30 = vrot.slane %v294_v24, 5  ;;  %v232_v32 = vld [vmem:[%s2738_s10 + $0xe0] sm:$0xf]  ;;  %239 = vst [vmem:[#allocation2 + $0xd8] sm:$0xf] %v231_v31 }
  0x19   : > { %2604 = vmatpush.bf16.msra.mxu1 %v2510_v10  ;;  %1566 = vmatpush.bf16.msra.mxu0 %v2510_v10  ;;  %v227_v33 = vld [vmem:[%s2738_s10 + $0x40] sm:$0xff]   ;;  %v283_v35 = vor.u32 %v282_v28, %v279_v23  ;;  %240 = vst [vmem:[#allocation2 + $0xfc] sm:$0xf] %v232_v32  ;;  %v2507_v57 = vld [vmem:[%s3148_s1 + $0x8] sm:$0xff]  ;;  %v314_v58 = vshll.u32 %v262_v52, 16  ;;  %v328_v0 = vshll.u32 %v264_v54, 16 }
  0x1a   : > { %1624 = vmatpush.bf16.msra.mxu2 %v2526_v13  ;;  %v228_v37 = vld [vmem:[%s2738_s10 + $0x60] sm:$0xff]   ;;  %v297_v39 = vor.u32 %v296_v30, %v293_v29  ;;  %235 = vst [vmem:[#allocation2 + $0x48] sm:$0xff] %v227_v33   ;;  %v2523_v61 = vld [vmem:[%s3148_s1 + $0x88] sm:$0xff]  ;;  %v2109_v2 = vld [vmem:[#allocation2 + $0x90] sm:$0xf] }
  0x1b   : > { %1653 = vmatpush.bf16.msra.mxu3 %v2534_v27  ;;  %v284_v43 = vrot.slane %v283_v35, 4  ;;  %236 = vst [vmem:[#allocation2 + $0x6c] sm:$0xff] %v228_v37   ;;  %v261_v50 = vld [vmem:[%s2738_s10 + $0x40] sm:$0xf]  ;;  %v2492_v5 = vld [vmem:[#allocation2 + $0xb0] sm:$0xf0] }
  0x1c   : > { %v298_v46 = vrot.slane %v297_v39, 4  ;;  %v263_v53 = vld [vmem:[%s2738_s10 + $0x60] sm:$0xf]  ;;  %v305_v55 = vshrl.u32 %v261_v50, 16  ;;  %v308_v56 = vshll.u32 %v261_v50, 16  ;;  %416 = vst [vmem:[#allocation2 + $0x30] sm:$0xff] %v1972_v49   ;;  %v2110_v28 = vor.u32 %v2492_v5, %v2109_v2 }
  0x1d   : > { %2605 = vmatpush.bf16.msra.mxu1 %v2509_v26  ;;  %1567 = vmatpush.bf16.msra.mxu0 %v2509_v26  ;;  %v289_v47 = vsel %vm2775_vm2, %v284_v43, %v288_v36  ;;  %v319_v59 = vshrl.u32 %v263_v53, 16  ;;  %v322_v60 = vshll.u32 %v263_v53, 16  ;;  %v2506_v1 = vld [vmem:[%s3148_s1] sm:$0xff]  ;;  %v2521_v6 = vld [vmem:[%s3148_s1 + $0x78] sm:$0xff]  ;;  %v2531_v8 = vld [vmem:[%s3148_s1 + $0xc8] sm:$0xff]  ;;  %v316_v10 = vrot.slane %v314_v58, 5 }
  0x1e   : > { %1625 = vmatpush.bf16.msra.mxu2 %v2525_v34  ;;  %v303_v51 = vsel %vm2775_vm2, %v298_v46, %v302_v40  ;;  %396 = vst [vmem:[#allocation2 + $0x8] sm:$0xf] %v289_v47  ;;  %v307_v62 = vrot.slane %v305_v55, 4  ;;  %v310_v63 = vrot.slane %v308_v56, 5  ;;  %v2522_v7 = vld [vmem:[%s3148_s1 + $0x80] sm:$0xff]  ;;  %v2545_v14 = vld [vmem:[%s3148_s1 + $0x138] sm:$0xff] }
  0x1f   : > { %1654 = vmatpush.bf16.msra.mxu3 %v2533_v42  ;;  %397 = vst [vmem:[#allocation2 + $0x2c] sm:$0xf] %v303_v51  ;;  %v321_v3 = vrot.slane %v319_v59, 4  ;;  %v324_v4 = vrot.slane %v322_v60, 5  ;;  %v265_v11 = vld [vmem:[%s2738_s10 + $0x80] sm:$0xf] }
  0x20   : > { %v311_v9 = vor.u32 %v310_v63, %v307_v62  ;;  %v2037_v12 = vld [vmem:[#allocation2] sm:$0xf]  ;;  %v2474_v13 = vld [vmem:[#allocation2 + $0x20] sm:$0xf0]  ;;  %v2561_v15 = vld [vmem:[%s3148_s1 + $0x1b8] sm:$0xff]  ;;  %v330_v17 = vrot.slane %v328_v0, 5 }
  0x21   : > { %2606 = vmatpush.bf16.msra.mxu1 %v2508_v44  ;;  %1568 = vmatpush.bf16.msra.mxu0 %v2508_v44  ;;  %v325_v16 = vor.u32 %v324_v4, %v321_v3  ;;  %v266_v20 = vld [vmem:[%s2738_s10 + $0x88] sm:$0x1]  ;;  %v333_v21 = vshrl.u32 %v265_v11, 16  ;;  %v2530_v23 = vld [vmem:[%s3148_s1 + $0xc0] sm:$0xff]  ;;  %v2471_v24 = vld [vmem:[#allocation2 + $0xc] sm:$0xf]  ;;  %v2038_v30 = vor.u32 %v2474_v13, %v2037_v12 }
  0x22   : > { %1626 = vmatpush.bf16.msra.mxu2 %v2524_v45  ;;  %v312_v19 = vrot.slane %v311_v9, 4  ;;  %v1973_v26 = vld [vmem:[%s2738_s10 + $0x50] sm:$0xff]   ;;  %v267_v27 = vld [vmem:[%s2738_s10 + $0xa0] sm:$0xf]  ;;  %v2569_v33 = vld [vmem:[%s3148_s1 + $0x1f8] sm:$0xff]  ;;  %v336_v41 = vshll.u32 %v265_v11, 16 }
  0x23   : > { %1655 = vmatpush.bf16.msra.mxu3 %v2532_v48  ;;  %v326_v25 = vrot.slane %v325_v16, 4  ;;  %v2520_v29 = vld [vmem:[%s3148_s1 + $0x70] sm:$0xff]  ;;  %417 = vst [vmem:[#allocation2 + $0x54] sm:$0xff] %v1973_v26   ;;  %v268_v39 = vld [vmem:[%s2738_s10 + $0xa8] sm:$0x1]  ;;  %v335_v40 = vrot.slane %v333_v21, 4 }
  0x24   : > { %v2047_v31 = vld [vmem:[#allocation2 + $0x2c] sm:$0xf0]  ;;  %v317_v32 = vsel %vm2775_vm2, %v312_v19, %v316_v10  ;;  %v342_v42 = vshll.u32 %v266_v20, 16  ;;  %v347_v43 = vshrl.u32 %v267_v27, 16  ;;  %v350_v45 = vshll.u32 %v267_v27, 16  ;;  %v2519_v51 = vld [vmem:[%s3148_s1 + $0x68] sm:$0xff] }
  0x25   : > { %2607 = vmatpush.bf16.msra.mxu1 %v2507_v57  ;;  %1569 = vmatpush.bf16.msra.mxu0 %v2507_v57  ;;  %v2045_v18 = vld [vmem:[#allocation2 + $0x8] sm:$0xf]  ;;  %v1974_v34 = vld [vmem:[%s2738_s10 + $0x70] sm:$0xff]   ;;  %v331_v37 = vsel %vm2775_vm2, %v326_v25, %v330_v17  ;;  %398 = vst [vmem:[#allocation2 + $0x50] sm:$0xf] %v317_v32  ;;  %v356_v46 = vshll.u32 %v268_v39, 16  ;;  %v2050_v47 = vor.u32 %v2471_v24, %v2047_v31 }
  0x26   : > { %1627 = vmatpush.bf16.msra.mxu2 %v2523_v61  ;;  %v2475_v22 = vld [vmem:[#allocation2 + $0x28] sm:$0xf0]  ;;  %v2544_v36 = vld [vmem:[%s3148_s1 + $0x130] sm:$0xff]  ;;  %399 = vst [vmem:[#allocation2 + $0x74] sm:$0xf] %v331_v37  ;;  %v338_v48 = vrot.slane %v336_v41, 5 }
  0x27   : > { %1656 = vmatpush.bf16.msra.mxu3 %v2531_v8  ;;  %v2046_v35 = vor.u32 %v2475_v22, %v2045_v18  ;;  %v2560_v44 = vld [vmem:[%s3148_s1 + $0x1b0] sm:$0xff]  ;;  %418 = vst [vmem:[#allocation2 + $0x78] sm:$0xff] %v1974_v34   ;;  %v349_v49 = vrot.slane %v347_v43, 4  ;;  %v352_v50 = vrot.slane %v350_v45, 5  ;;  %v344_v54 = vrot.slane %v342_v42, 5  ;;  %v2543_v55 = vld [vmem:[%s3148_s1 + $0x128] sm:$0xff] }
  0x28   : > { %v2568_v52 = vld [vmem:[%s3148_s1 + $0x1f0] sm:$0xff]  ;;  %v339_v53 = vor.u32 %v338_v48, %v335_v40  ;;  %v2559_v56 = vld [vmem:[%s3148_s1 + $0x1a8] sm:$0xff]  ;;  %v358_v58 = vrot.slane %v356_v46, 5  ;;  %v269_v60 = vld [vmem:[%s2738_s10 + $0xc0] sm:$0xf] }
  0x29   : > { %2608 = vmatpush.bf16.msra.mxu1 %v2506_v1  ;;  %1570 = vmatpush.bf16.msra.mxu0 %v2506_v1  ;;  %v353_v57 = vor.u32 %v352_v50, %v349_v49  ;;  %v271_v62 = vld [vmem:[%s2738_s10 + $0xe0] sm:$0xf]  ;;  %v361_v63 = vshrl.u32 %v269_v60, 16  ;;  %v2567_v2 = vld [vmem:[%s3148_s1 + $0x1e8] sm:$0xff]  ;;  %v364_v3 = vshll.u32 %v269_v60, 16  ;;  %v2517_v20 = vld [vmem:[%s3148_s1 + $0x58] sm:$0xff] }
  0x2a   : > { %1628 = vmatpush.bf16.msra.mxu2 %v2522_v7  ;;  %v340_v59 = vrot.slane %v339_v53, 4  ;;  %v2518_v0 = vld [vmem:[%s3148_s1 + $0x60] sm:$0xff]  ;;  %v375_v4 = vshrl.u32 %v271_v62, 16  ;;  %v2145_v5 = vld [vmem:[#allocation2 + $0xd8] sm:$0xf]  ;;  %v378_v12 = vshll.u32 %v271_v62, 16 }
  0x2b   : > { %1657 = vmatpush.bf16.msra.mxu3 %v2530_v23  ;;  %v354_v61 = vrot.slane %v353_v57, 4  ;;  %v2542_v7 = vld [vmem:[%s3148_s1 + $0x120] sm:$0xff]  ;;  %v2073_v8 = vld [vmem:[#allocation2 + $0x48] sm:$0xf]  ;;  %v363_v11 = vrot.slane %v361_v63, 4  ;;  %v366_v16 = vrot.slane %v364_v3, 5 }
  0x2c   : > { %1581 = vmatmul.bf16.vlgmr.msra.gmra.mxu1 %v2110_v28  ;;  %1571 = vmatmul.bf16.vlgmr.msra.gmra.mxu0 %v2038_v30  ;;  %v345_v1 = vsel %vm2775_vm2, %v340_v59, %v344_v54  ;;  %v2558_v10 = vld [vmem:[%s3148_s1 + $0x1a0] sm:$0xff]  ;;  %v270_v13 = vld [vmem:[%s2738_s10 + $0xc8] sm:$0x1]  ;;  %v377_v18 = vrot.slane %v375_v4, 4  ;;  %v380_v19 = vrot.slane %v378_v12, 5  ;;  %v2541_v24 = vld [vmem:[%s3148_s1 + $0x118] sm:$0xff] }
  0x2d   : > { %1592 = vmatpush.bf16.msrb.mxu1 %v2521_v6  ;;  %1679 = vmatpush.bf16.msrb.mxu0 %v2545_v14  ;;  %v2501_v6 = vld [vmem:[#allocation2 + $0xf8] sm:$0xf0]  ;;  %v359_v9 = vsel %vm2775_vm2, %v354_v61, %v358_v58  ;;  %400 = vst [vmem:[#allocation2 + $0x98] sm:$0xf] %v345_v1  ;;  %v272_v14 = vld [vmem:[%s2738_s10 + $0xe8] sm:$0x1]  ;;  %v367_v27 = vor.u32 %v366_v16, %v363_v11 }
  0x2e   : > { %1737 = vmatpush.bf16.msrb.mxu2 %v2561_v15  ;;  %1658 = vmatmul.bf16.vlgmr.msra.gmra.mxu3 %v2050_v47  ;;  %401 = vst [vmem:[#allocation2 + $0xbc] sm:$0xf] %v359_v9  ;;  %v2483_v15 = vld [vmem:[#allocation2 + $0x68] sm:$0xf0]  ;;  %v370_v17 = vshll.u32 %v270_v13, 16  ;;  %v384_v23 = vshll.u32 %v272_v14, 16  ;;  %v2146_v30 = vor.u32 %v2501_v6, %v2145_v5 }
  0x2f   : > { %1629 = vmatmul.bf16.vlgmr.msra.gmra.mxu2 %v2046_v35  ;;  %1766 = vmatpush.bf16.msrb.mxu3 %v2569_v33  ;;  %v2081_v21 = vld [vmem:[#allocation2 + $0x50] sm:$0xf]  ;;  %v2484_v22 = vld [vmem:[#allocation2 + $0x70] sm:$0xf0]  ;;  %v2074_v31 = vor.u32 %v2483_v15, %v2073_v8  ;;  %v2083_v35 = vld [vmem:[#allocation2 + $0x74] sm:$0xf0] }
  0x30   : > { %v1975_v25 = vld [vmem:[%s2738_s10 + $0x90] sm:$0xff]   ;;  %v372_v28 = vrot.slane %v370_v17, 5  ;;  %v386_v33 = vrot.slane %v384_v23, 5  ;;  %v2082_v34 = vor.u32 %v2484_v22, %v2081_v21  ;;  %v2566_v45 = vld [vmem:[%s3148_s1 + $0x1e0] sm:$0xff]  ;;  %v2515_v46 = vld [vmem:[%s3148_s1 + $0x48] sm:$0xff] }
  0x31   : > { %1593 = vmatpush.bf16.msrb.mxu1 %v2520_v29  ;;  %1680 = vmatpush.bf16.msrb.mxu0 %v2544_v36  ;;  %v1976_v26 = vld [vmem:[%s2738_s10 + $0xb0] sm:$0xff]   ;;  %v381_v29 = vor.u32 %v380_v19, %v377_v18  ;;  %419 = vst [vmem:[#allocation2 + $0x9c] sm:$0xff] %v1975_v25   ;;  %v368_v36 = vrot.slane %v367_v27, 4  ;;  %v2539_v48 = vld [vmem:[%s3148_s1 + $0x108] sm:$0xff]  ;;  %v2565_v49 = vld [vmem:[%s3148_s1 + $0x1d8] sm:$0xff] }
  0x32   : > { %1738 = vmatpush.bf16.msrb.mxu2 %v2560_v44  ;;  %v2480_v32 = vld [vmem:[#allocation2 + $0x54] sm:$0xf]  ;;  %420 = vst [vmem:[#allocation2 + $0xc0] sm:$0xff] %v1976_v26   ;;  %v2557_v44 = vld [vmem:[%s3148_s1 + $0x198] sm:$0xff]  ;;  %v245_v50 = vld [vmem:[%s2738_s10 + $0x84] sm:$0xf] }
  0x33   : > { %1767 = vmatpush.bf16.msrb.mxu3 %v2568_v52  ;;  %v382_v37 = vrot.slane %v381_v29, 4  ;;  %v2516_v39 = vld [vmem:[%s3148_s1 + $0x50] sm:$0xff]  ;;  %v373_v41 = vsel %vm2775_vm2, %v368_v36, %v372_v28  ;;  %v2086_v43 = vor.u32 %v2480_v32, %v2083_v35  ;;  %253 = vst [vmem:[#allocation2 + $0x94] sm:$0xf] %v245_v50  ;;  %v2514_v52 = vld [vmem:[%s3148_s1 + $0x40] sm:$0xff]  ;;  %v2553_v53 = vld [vmem:[%s3148_s1 + $0x178] sm:$0xff] }
  0x34   : > { %v2540_v40 = vld [vmem:[%s3148_s1 + $0x110] sm:$0xff]  ;;  %402 = vst [vmem:[#allocation2 + $0xe0] sm:$0xf] %v373_v41  ;;  %v2538_v54 = vld [vmem:[%s3148_s1 + $0x100] sm:$0xff]  ;;  %v2039_v57 = vld [vmem:[#allocation2 + $0x24] sm:$0xf0] }
  0x35   : > { %1594 = vmatpush.bf16.msrb.mxu1 %v2519_v51  ;;  %1681 = vmatpush.bf16.msrb.mxu0 %v2543_v55  ;;  %v387_v42 = vsel %vm2775_vm2, %v382_v37, %v386_v33  ;;  %v2556_v47 = vld [vmem:[%s3148_s1 + $0x190] sm:$0xff]  ;;  %v246_v51 = vld [vmem:[%s2738_s10 + $0xa4] sm:$0xf]  ;;  %v2117_v60 = vld [vmem:[#allocation2 + $0x98] sm:$0xf] }
  0x36   : > { %1739 = vmatpush.bf16.msrb.mxu2 %v2559_v56  ;;  %403 = vst [vmem:[#allocation2 + $0x104] sm:$0xf] %v387_v42  ;;  %v2470_v55 = vld [vmem:[#allocation2 + $0x4] sm:$0xf]  ;;  %v2577_v56 = vld [vmem:[%s3148_s1 + $0x238] sm:$0xff]  ;;  %v2552_v62 = vld [vmem:[%s3148_s1 + $0x170] sm:$0xff] }
  0x37   : > { %1768 = vmatpush.bf16.msrb.mxu3 %v2567_v2  ;;  %254 = vst [vmem:[#allocation2 + $0xb8] sm:$0xf] %v246_v51  ;;  %v2053_v58 = vld [vmem:[#allocation2 + $0x10] sm:$0xf]  ;;  %v2476_v59 = vld [vmem:[#allocation2 + $0x30] sm:$0xf0]  ;;  %v2042_v1 = vor.u32 %v2470_v55, %v2039_v57 }
  0x38   : > { %v2493_v61 = vld [vmem:[#allocation2 + $0xb8] sm:$0xf0]  ;;  %v1977_v63 = vld [vmem:[%s2738_s10 + $0xd0] sm:$0xff]   ;;  %v2054_v2 = vor.u32 %v2476_v59, %v2053_v58  ;;  %v2004_v8 = vld [vmem:[%s2738_s10 + $0x40] sm:$0xff]  }
  0x39   : > { %1595 = vmatpush.bf16.msrb.mxu1 %v2518_v0  ;;  %1682 = vmatpush.bf16.msrb.mxu0 %v2542_v7  ;;  %v1978_v0 = vld [vmem:[%s2738_s10 + $0xf0] sm:$0xff]   ;;  %v2489_v3 = vld [vmem:[#allocation2 + $0x9c] sm:$0xf]  ;;  %421 = vst [vmem:[#allocation2 + $0xe4] sm:$0xff] %v1977_v63   ;;  %v2118_v5 = vor.u32 %v2493_v61, %v2117_v60  ;;  %v2119_v6 = vld [vmem:[#allocation2 + $0xbc] sm:$0xf0] }
  0x3a   : > { %1740 = vmatpush.bf16.msrb.mxu2 %v2558_v10  ;;  %v2576_v4 = vld [vmem:[%s3148_s1 + $0x230] sm:$0xff]  ;;  %422 = vst [vmem:[#allocation2 + $0x108] sm:$0xff] %v1978_v0   ;;  %v2003_v7 = vld [vmem:[%s2738_s10 + $0x20] sm:$0xff]   ;;  %v2551_v9 = vld [vmem:[%s3148_s1 + $0x168] sm:$0xff]  ;;  %v2122_v11 = vor.u32 %v2489_v3, %v2119_v6 }
  0x3b   : > { %1769 = vmatpush.bf16.msrb.mxu3 %v2566_v45  ;;  %595 = vst [vmem:[#allocation2 + $0x18] sm:$0xff] %v2003_v7   ;;  %v2555_v10 = vld [vmem:[%s3148_s1 + $0x188] sm:$0xff]  ;;  %v2564_v12 = vld [vmem:[%s3148_s1 + $0x1d0] sm:$0xff]  ;;  %v2550_v14 = vld [vmem:[%s3148_s1 + $0x160] sm:$0xff] }
  0x3c   : > { %1586 = vmatmul.bf16.gmra.mxu1 %v2146_v30  ;;  %1576 = vmatmul.bf16.gmra.mxu0 %v2074_v31  ;;  %596 = vst [vmem:[#allocation2 + $0x3c] sm:$0xff] %v2004_v8   ;;  %v2575_v13 = vld [vmem:[%s3148_s1 + $0x228] sm:$0xff]  ;;  %v2554_v15 = vld [vmem:[%s3148_s1 + $0x180] sm:$0xff]  ;;  %v2075_v22 = vld [vmem:[#allocation2 + $0x6c] sm:$0xf0] }
  0x3d   : > { %1596 = vmatpush.bf16.msrb.mxu1 %v2517_v20  ;;  %1683 = vmatpush.bf16.msrb.mxu0 %v2541_v24  ;;  %v2563_v16 = vld [vmem:[%s3148_s1 + $0x1c8] sm:$0xff]  ;;  %v247_v17 = vld [vmem:[%s2738_s10 + $0xc4] sm:$0xf]  ;;  %v2549_v20 = vld [vmem:[%s3148_s1 + $0x158] sm:$0xff] }
  0x3e   : > { %1741 = vmatpush.bf16.msrb.mxu2 %v2557_v44  ;;  %1663 = vmatmul.bf16.gmra.mxu3 %v2086_v43  ;;  %v248_v18 = vld [vmem:[%s2738_s10 + $0xe4] sm:$0xf]  ;;  %255 = vst [vmem:[#allocation2 + $0xdc] sm:$0xf] %v247_v17  ;;  %v2479_v21 = vld [vmem:[#allocation2 + $0x4c] sm:$0xf] }
  0x3f   : > { %1634 = vmatmul.bf16.gmra.mxu2 %v2082_v34  ;;  %1770 = vmatpush.bf16.msrb.mxu3 %v2565_v49  ;;  %v2968_v19 = vld [vmem:[%s3148_s1 + $0x220] sm:$0xff]  ;;  %256 = vst [vmem:[#allocation2 + $0x100] sm:$0xf] %v248_v18  ;;  %v2089_v23 = vld [vmem:[#allocation2 + $0x58] sm:$0xf]  ;;  %v2548_v28 = vld [vmem:[%s3148_s1 + $0x150] sm:$0xff]  ;;  %v2078_v29 = vor.u32 %v2479_v21, %v2075_v22 }
  0x40   : > { %v2485_v24 = vld [vmem:[#allocation2 + $0x78] sm:$0xf0]  ;;  %v2153_v25 = vld [vmem:[#allocation2 + $0xe0] sm:$0xf]  ;;  %v2502_v26 = vld [vmem:[#allocation2 + $0x100] sm:$0xf0] }
  0x41   : > { %1597 = vmatpush.bf16.msrb.mxu1 %v2516_v39  ;;  %1684 = vmatpush.bf16.msrb.mxu0 %v2540_v40  ;;  %v2498_v27 = vld [vmem:[#allocation2 + $0xe4] sm:$0xf]  ;;  %v2090_v30 = vor.u32 %v2485_v24, %v2089_v23  ;;  %v2155_v31 = vld [vmem:[#allocation2 + $0x104] sm:$0xf0]  ;;  %v1987_v32 = vld [vmem:[%s2738_s10 + $0x10] sm:$0xf]  ;;  %v2154_v34 = vor.u32 %v2502_v26, %v2153_v25 }
  0x42   : > { %1742 = vmatpush.bf16.msrb.mxu2 %v2556_v47  ;;  %v1989_v33 = vld [vmem:[%s2738_s10 + $0x30] sm:$0xf]  ;;  %v2005_v35 = vld [vmem:[%s2738_s10 + $0x60] sm:$0xff]   ;;  %v456_v37 = vshrl.u32 %v1987_v32, 16  ;;  %v459_v39 = vshll.u32 %v1987_v32, 16  ;;  %v2158_v45 = vor.u32 %v2498_v27, %v2155_v31  ;;  %v2573_v50 = vld [vmem:[%s3148_s1 + $0x218] sm:$0xff] }
  0x43   : > { %1771 = vmatpush.bf16.msrb.mxu3 %v2564_v12  ;;  %v2006_v36 = vld [vmem:[%s2738_s10 + $0x80] sm:$0xff]   ;;  %v470_v40 = vshrl.u32 %v1989_v33, 16  ;;  %597 = vst [vmem:[#allocation2 + $0x60] sm:$0xff] %v2005_v35   ;;  %v473_v41 = vshll.u32 %v1989_v33, 16  ;;  %v1990_v55 = vld [vmem:[%s2738_s10 + $0x38] sm:$0x1] }
  0x44   : > { %598 = vst [vmem:[#allocation2 + $0x84] sm:$0xff] %v2006_v36   ;;  %v458_v42 = vrot.slane %v456_v37, 4  ;;  %v461_v43 = vrot.slane %v459_v39, 5  ;;  %v2562_v47 = vld [vmem:[%s3148_s1 + $0x1c0] sm:$0xff]  ;;  %v479_v59 = vshll.u32 %v1990_v55, 16  ;;  %v2571_v12 = vld [vmem:[%s3148_s1 + $0x208] sm:$0xff] }
  0x45   : > { %1598 = vmatpush.bf16.msrb.mxu1 %v2515_v46  ;;  %1685 = vmatpush.bf16.msrb.mxu0 %v2539_v48  ;;  %v472_v44 = vrot.slane %v470_v40, 4  ;;  %v2547_v46 = vld [vmem:[%s3148_s1 + $0x148] sm:$0xff]  ;;  %v475_v48 = vrot.slane %v473_v41, 5  ;;  %v2546_v51 = vld [vmem:[%s3148_s1 + $0x140] sm:$0xff]  ;;  %v2488_v0 = vld [vmem:[#allocation2 + $0x94] sm:$0xf] }
  0x46   : > { %1743 = vmatpush.bf16.msrb.mxu2 %v2555_v10  ;;  %v462_v49 = vor.u32 %v461_v43, %v458_v42  ;;  %v2019_v60 = vld [vmem:[%s2738_s10 + $0x20] sm:$0xf]  ;;  %v481_v3 = vrot.slane %v479_v59, 5  ;;  %v2494_v6 = vld [vmem:[#allocation2 + $0xc0] sm:$0xf0] }
  0x47   : > { %1772 = vmatpush.bf16.msrb.mxu3 %v2563_v16  ;;  %v2021_v61 = vld [vmem:[%s2738_s10 + $0x40] sm:$0xf]  ;;  %v639_v63 = vshll.u32 %v2019_v60, 16  ;;  %v2022_v7 = vld [vmem:[%s2738_s10 + $0x48] sm:$0x1] }
  0x48   : > { %v653_v16 = vshll.u32 %v2021_v61, 16  ;;  %v2477_v17 = vld [vmem:[#allocation2 + $0x38] sm:$0xf0]  ;;  %v2063_v25 = vld [vmem:[#allocation2 + $0x3c] sm:$0xf0] }
  0x49   : > { %1599 = vmatpush.bf16.msrb.mxu1 %v2514_v52  ;;  %1686 = vmatpush.bf16.msrb.mxu0 %v2538_v54  ;;  %v476_v52 = vor.u32 %v475_v48, %v472_v44  ;;  %v1988_v54 = vld [vmem:[%s2738_s10 + $0x18] sm:$0x1]  ;;  %v2473_v24 = vld [vmem:[#allocation2 + $0x1c] sm:$0xf]  ;;  %v1991_v31 = vld [vmem:[%s2738_s10 + $0x50] sm:$0xf] }
  0x4a   : > { %1744 = vmatpush.bf16.msrb.mxu2 %v2554_v15  ;;  %v465_v57 = vshll.u32 %v1988_v54, 16  ;;  %v650_v15 = vshrl.u32 %v2021_v61, 16  ;;  %v655_v22 = vrot.slane %v653_v16, 5  ;;  %v1993_v32 = vld [vmem:[%s2738_s10 + $0x70] sm:$0xf]  ;;  %v2008_v35 = vld [vmem:[%s2738_s10 + $0xc0] sm:$0xff]   ;;  %v2066_v44 = vor.u32 %v2473_v24, %v2063_v25 }
  0x4b   : > { %1773 = vmatpush.bf16.msrb.mxu3 %v2562_v47  ;;  %v477_v58 = vrot.slane %v476_v52, 4  ;;  %v484_v36 = vshrl.u32 %v1991_v31, 16  ;;  %v487_v37 = vshll.u32 %v1991_v31, 16  ;;  %v498_v39 = vshrl.u32 %v1993_v32, 16  ;;  %600 = vst [vmem:[#allocation2 + $0xcc] sm:$0xff] %v2008_v35   ;;  %v2009_v35 = vld [vmem:[%s2738_s10 + $0xe0] sm:$0xff]  }
  0x4c   : > { %1600 = vmatmul.bf16.vlgmr.msrb.gmra.mxu1 %v2042_v1  ;;  %1687 = vmatmul.bf16.vlgmr.msrb.gmra.mxu0 %v2054_v2  ;;  %v2111_v1 = vld [vmem:[#allocation2 + $0xb4] sm:$0xf0]  ;;  %v467_v2 = vrot.slane %v465_v57, 5  ;;  %v652_v21 = vrot.slane %v650_v15, 4  ;;  %v501_v41 = vshll.u32 %v1993_v32, 16  ;;  %601 = vst [vmem:[#allocation2 + $0xf0] sm:$0xff] %v2009_v35  }
  0x4d   : > { %1708 = vmatpush.bf16.msra.mxu1 %v2553_v53  ;;  %1795 = vmatpush.bf16.msra.mxu0 %v2577_v56  ;;  %v2572_v53 = vld [vmem:[%s3148_s1 + $0x210] sm:$0xff]  ;;  %v2114_v23 = vor.u32 %v2488_v0, %v2111_v1  ;;  %v486_v42 = vrot.slane %v484_v36, 4  ;;  %v489_v43 = vrot.slane %v487_v37, 5  ;;  %v500_v47 = vrot.slane %v498_v39, 4  ;;  %v2023_v55 = vld [vmem:[%s2738_s10 + $0x60] sm:$0xf] }
  0x4e   : > { %1668 = vmatmul.bf16.gmra.mxu3 %v2122_v11  ;;  %2609 = vmatpush.bf16.msra.mxu2 %v2577_v56  ;;  %v463_v56 = vrot.slane %v462_v49, 4  ;;  %v2061_v11 = vld [vmem:[#allocation2 + $0x18] sm:$0xf]  ;;  %v2025_v57 = vld [vmem:[%s2738_s10 + $0x80] sm:$0xf]  ;;  %v667_v59 = vshll.u32 %v2023_v55, 16 }
  0x4f   : > { %1639 = vmatmul.bf16.gmra.mxu2 %v2118_v5  ;;  %v2125_v5 = vld [vmem:[#allocation2 + $0xa0] sm:$0xf]  ;;  %v490_v48 = vor.u32 %v489_v43, %v486_v42  ;;  %v1992_v49 = vld [vmem:[%s2738_s10 + $0x58] sm:$0x1]  ;;  %v2024_v1 = vld [vmem:[%s2738_s10 + $0x68] sm:$0x1] }
  0x50   : > { %v2126_v27 = vor.u32 %v2494_v6, %v2125_v5  ;;  %v2161_v5 = vld [vmem:[#allocation2 + $0xe8] sm:$0xf]  ;;  %v2503_v6 = vld [vmem:[#allocation2 + $0x108] sm:$0xf0]  ;;  %v2486_v15 = vld [vmem:[#allocation2 + $0x80] sm:$0xf0] }
  0x51   : > { %1709 = vmatpush.bf16.msra.mxu1 %v2552_v62  ;;  %1796 = vmatpush.bf16.msra.mxu0 %v2576_v4  ;;  %v636_v62 = vshrl.u32 %v2019_v60, 16  ;;  %v491_v52 = vrot.slane %v490_v48, 4  ;;  %v2162_v24 = vor.u32 %v2503_v6, %v2161_v5  ;;  %v2010_v37 = vld [vmem:[%s2738_s10 + $0x100] sm:$0xff]   ;;  %v1996_v42 = vld [vmem:[%s2738_s10 + $0x98] sm:$0x1] }
  0x52   : > { %2610 = vmatpush.bf16.msra.mxu2 %v2576_v4  ;;  %v2020_v4 = vld [vmem:[%s2738_s10 + $0x28] sm:$0x1]  ;;  %v1998_v43 = vld [vmem:[%s2738_s10 + $0xb8] sm:$0x1]  ;;  %602 = vst [vmem:[#allocation2 + $0x114] sm:$0xff] %v2010_v37  }
  0x53   : > { %v638_v8 = vrot.slane %v636_v62, 4  ;;  %v645_v10 = vshll.u32 %v2020_v4, 16  ;;  %v678_v62 = vshrl.u32 %v2025_v57, 16  ;;  %v2147_v4 = vld [vmem:[#allocation2 + $0xfc] sm:$0xf0]  ;;  %v535_v48 = vshll.u32 %v1998_v43, 16 }
  0x54   : > { %v2030_v6 = vld [vmem:[%s2738_s10 + $0xc8] sm:$0x1] }
  0x55   : > { %1710 = vmatpush.bf16.msra.mxu1 %v2551_v9  ;;  %1797 = vmatpush.bf16.msra.mxu0 %v2575_v13  ;;  %v641_v9 = vrot.slane %v639_v63, 5  ;;  %v681_v63 = vshll.u32 %v2025_v57, 16 }
  0x56   : > { %2611 = vmatpush.bf16.msra.mxu2 %v2575_v13  ;;  %v468_v13 = vsel %vm2775_vm2, %v463_v56, %v467_v2 }
  0x57   : > { %575 = vst [vmem:[#allocation2 + $0x14] sm:$0xf] %v468_v13  ;;  %v642_v18 = vor.u32 %v641_v9, %v638_v8  ;;  %v2026_v8 = vld [vmem:[%s2738_s10 + $0x88] sm:$0x1]  ;;  %v669_v9 = vrot.slane %v667_v59, 5  ;;  %v680_v13 = vrot.slane %v678_v62, 4 }
  0x59   : > { %1711 = vmatpush.bf16.msra.mxu1 %v2550_v14  ;;  %1798 = vmatpush.bf16.msra.mxu0 %v2968_v19  ;;  %v482_v14 = vsel %vm2775_vm2, %v477_v58, %v481_v3  ;;  %v643_v26 = vrot.slane %v642_v18, 4  ;;  %v664_v58 = vshrl.u32 %v2023_v55, 16  ;;  %v2497_v3 = vld [vmem:[#allocation2 + $0xdc] sm:$0xf]  ;;  %v687_v18 = vshll.u32 %v2026_v8, 16 }
  0x5a   : > { %2612 = vmatpush.bf16.msra.mxu2 %v2968_v19  ;;  %v647_v19 = vrot.slane %v645_v10, 5  ;;  %576 = vst [vmem:[#allocation2 + $0x38] sm:$0xf] %v482_v14  ;;  %v673_v10 = vshll.u32 %v2024_v1, 16  ;;  %v683_v14 = vrot.slane %v681_v63, 5 }
  0x5b   : > { %v666_v2 = vrot.slane %v664_v58, 4  ;;  %v2031_v58 = vld [vmem:[%s2738_s10 + $0xe0] sm:$0xf] }
  0x5c   : > { %1605 = vmatmul.bf16.gmra.mxu1 %v2078_v29  ;;  %1692 = vmatmul.bf16.gmra.mxu0 %v2090_v30  ;;  %v656_v29 = vor.u32 %v655_v22, %v652_v21  ;;  %v648_v33 = vsel %vm2775_vm2, %v643_v26, %v647_v19  ;;  %v684_v19 = vor.u32 %v683_v14, %v680_v13  ;;  %v689_v22 = vrot.slane %v687_v18, 5 }
  0x5d   : > { %1712 = vmatpush.bf16.msra.mxu1 %v2549_v20  ;;  %1799 = vmatpush.bf16.msra.mxu0 %v2573_v50  ;;  %v659_v20 = vshll.u32 %v2022_v7, 16  ;;  %755 = vst [vmem:[#allocation2 + $0x20] sm:$0xf] %v648_v33  ;;  %v670_v16 = vor.u32 %v669_v9, %v666_v2  ;;  %v720_v63 = vshrl.u32 %v2031_v58, 16  ;;  %v715_v14 = vshll.u32 %v2030_v6, 16 }
  0x5e   : > { %1673 = vmatmul.bf16.gmra.mxu3 %v2158_v45  ;;  %2613 = vmatpush.bf16.msra.mxu2 %v2573_v50  ;;  %v657_v40 = vrot.slane %v656_v29, 4  ;;  %v2570_v45 = vld [vmem:[%s3148_s1 + $0x200] sm:$0xff]  ;;  %v1994_v50 = vld [vmem:[%s2738_s10 + $0x78] sm:$0x1]  ;;  %v685_v26 = vrot.slane %v684_v19, 4 }
  0x5f   : > { %1644 = vmatmul.bf16.gmra.mxu2 %v2154_v34  ;;  %v661_v30 = vrot.slane %v659_v20, 5  ;;  %v2007_v34 = vld [vmem:[%s2738_s10 + $0xa0] sm:$0xff]   ;;  %v507_v54 = vshll.u32 %v1994_v50, 16  ;;  %v671_v21 = vrot.slane %v670_v16, 4  ;;  %v2099_v29 = vld [vmem:[#allocation2 + $0x84] sm:$0xf0] }
  0x60   : > { %599 = vst [vmem:[#allocation2 + $0xa8] sm:$0xff] %v2007_v34   ;;  %v2482_v20 = vld [vmem:[#allocation2 + $0x64] sm:$0xf]  ;;  %v690_v34 = vsel %vm2775_vm2, %v685_v26, %v689_v22  ;;  %v2472_v59 = vld [vmem:[#allocation2 + $0x14] sm:$0xf]  ;;  %v722_v19 = vrot.slane %v720_v63, 4 }
  0x61   : > { %1713 = vmatpush.bf16.msra.mxu1 %v2548_v28  ;;  %1800 = vmatpush.bf16.msra.mxu0 %v2572_v53  ;;  %v2062_v28 = vor.u32 %v2477_v17, %v2061_v11  ;;  %v509_v61 = vrot.slane %v507_v54, 5  ;;  %v2097_v11 = vld [vmem:[#allocation2 + $0x60] sm:$0xf]  ;;  %v675_v17 = vrot.slane %v673_v10, 5  ;;  %758 = vst [vmem:[#allocation2 + $0x8c] sm:$0xf] %v690_v34 }
  0x62   : > { %2614 = vmatpush.bf16.msra.mxu2 %v2572_v53  ;;  %v493_v53 = vshll.u32 %v1992_v49, 16  ;;  %v2098_v25 = vor.u32 %v2486_v15, %v2097_v11  ;;  %v2027_v49 = vld [vmem:[%s2738_s10 + $0xa0] sm:$0xf]  ;;  %v2032_v15 = vld [vmem:[%s2738_s10 + $0xe8] sm:$0x1] }
  0x63   : > { %v2033_v22 = vld [vmem:[%s2738_s10 + $0x100] sm:$0xf]  ;;  %v2135_v26 = vld [vmem:[#allocation2 + $0xcc] sm:$0xf0] }
  0x64   : > { %v495_v60 = vrot.slane %v493_v53, 5  ;;  %v695_v53 = vshll.u32 %v2027_v49, 16  ;;  %v2069_v5 = vld [vmem:[#allocation2 + $0x20] sm:$0xf] }
  0x65   : > { %1714 = vmatpush.bf16.msra.mxu1 %v2547_v46  ;;  %1801 = vmatpush.bf16.msra.mxu0 %v2571_v12  ;;  %v662_v46 = vsel %vm2775_vm2, %v657_v40, %v661_v30  ;;  %v676_v30 = vsel %vm2775_vm2, %v671_v21, %v675_v17  ;;  %v717_v21 = vrot.slane %v715_v14, 5 }
  0x66   : > { %756 = vst [vmem:[#allocation2 + $0x44] sm:$0xf] %v662_v46  ;;  %2615 = vmatpush.bf16.msra.mxu2 %v2571_v12  ;;  %v496_v7 = vsel %vm2775_vm2, %v491_v52, %v495_v60  ;;  %v521_v46 = vshll.u32 %v1996_v42, 16  ;;  %v692_v52 = vshrl.u32 %v2027_v49, 16 }
  0x67   : > { %577 = vst [vmem:[#allocation2 + $0x5c] sm:$0xf] %v496_v7  ;;  %v2133_v11 = vld [vmem:[#allocation2 + $0xa8] sm:$0xf] }
  0x68   : > { %757 = vst [vmem:[#allocation2 + $0x68] sm:$0xf] %v676_v30  ;;  %v523_v54 = vrot.slane %v521_v46, 5  ;;  %v694_v60 = vrot.slane %v692_v52, 4  ;;  %v734_v30 = vshrl.u32 %v2033_v22, 16 }
  0x69   : > { %1715 = vmatpush.bf16.msra.mxu1 %v2546_v51  ;;  %1802 = vmatpush.bf16.msra.mxu0 %v2570_v45  ;;  %v503_v51 = vrot.slane %v501_v41, 5  ;;  %v2102_v41 = vor.u32 %v2482_v20, %v2099_v29  ;;  %v729_v29 = vshll.u32 %v2032_v15, 16  ;;  %v2000_v52 = vld [vmem:[%s2738_s10 + $0xd8] sm:$0x1] }
  0x6a   : > { %2616 = vmatpush.bf16.msra.mxu2 %v2570_v45  ;;  %v736_v37 = vrot.slane %v734_v30, 4 }
  0x6b   : > { %v504_v56 = vor.u32 %v503_v51, %v500_v47  ;;  %v2029_v51 = vld [vmem:[%s2738_s10 + $0xc0] sm:$0xf]  ;;  %v731_v42 = vrot.slane %v729_v29, 5 }
  0x6c   : > { %1610 = vmatmul.bf16.gmra.mxu1 %v2114_v23  ;;  %1697 = vmatmul.bf16.gmra.mxu0 %v2126_v27  ;;  %v2150_v23 = vor.u32 %v2497_v3, %v2147_v4  ;;  %v1995_v27 = vld [vmem:[%s2738_s10 + $0x90] sm:$0xf]  ;;  %v706_v57 = vshrl.u32 %v2029_v51, 16  ;;  %v709_v62 = vshll.u32 %v2029_v51, 16  ;;  %v2028_v3 = vld [vmem:[%s2738_s10 + $0xa8] sm:$0x1] }
  0x6d   : > { %v505_v0 = vrot.slane %v504_v56, 4  ;;  %v512_v31 = vshrl.u32 %v1995_v27, 16  ;;  %v515_v32 = vshll.u32 %v1995_v27, 16  ;;  %v537_v56 = vrot.slane %v535_v48, 5  ;;  %v2478_v10 = vld [vmem:[#allocation2 + $0x40] sm:$0xf0] }
  0x6e   : > { %1774 = vmatmul.bf16.vlgmr.msrb.gmra.mxu3 %v2066_v44  ;;  %v708_v4 = vrot.slane %v706_v57, 4  ;;  %v701_v8 = vshll.u32 %v2028_v3, 16  ;;  %v711_v9 = vrot.slane %v709_v62, 5  ;;  %v2481_v6 = vld [vmem:[#allocation2 + $0x5c] sm:$0xf] }
  0x6f   : > { %1745 = vmatmul.bf16.vlgmr.msrb.gmra.mxu2 %v2062_v28  ;;  %v510_v12 = vsel %vm2775_vm2, %v505_v0, %v509_v61  ;;  %v1997_v28 = vld [vmem:[%s2738_s10 + $0xb0] sm:$0xf]  ;;  %v514_v39 = vrot.slane %v512_v31, 4  ;;  %v517_v40 = vrot.slane %v515_v32, 5  ;;  %v697_v61 = vrot.slane %v695_v53, 5 }
  0x70   : > { %578 = vst [vmem:[#allocation2 + $0x80] sm:$0xf] %v510_v12  ;;  %v526_v33 = vshrl.u32 %v1997_v28, 16  ;;  %v529_v36 = vshll.u32 %v1997_v28, 16  ;;  %v2055_v0 = vld [vmem:[#allocation2 + $0x34] sm:$0xf0]  ;;  %v712_v18 = vor.u32 %v711_v9, %v708_v4  ;;  %v2070_v31 = vor.u32 %v2478_v10, %v2069_v5 }
  0x71   : > { %v518_v44 = vor.u32 %v517_v40, %v514_v39  ;;  %v698_v7 = vor.u32 %v697_v61, %v694_v60  ;;  %v2495_v12 = vld [vmem:[#allocation2 + $0xc8] sm:$0xf0]  ;;  %v703_v17 = vrot.slane %v701_v8, 5  ;;  %v2058_v20 = vor.u32 %v2472_v59, %v2055_v0  ;;  %v1999_v39 = vld [vmem:[%s2738_s10 + $0xd0] sm:$0xf] }
  0x72   : > { %v528_v45 = vrot.slane %v526_v33, 4  ;;  %v531_v47 = vrot.slane %v529_v36, 5  ;;  %v713_v28 = vrot.slane %v712_v18, 4  ;;  %v737_v33 = vshll.u32 %v2033_v22, 16  ;;  %v2001_v40 = vld [vmem:[%s2738_s10 + $0xf0] sm:$0xf] }
  0x73   : > { %v519_v50 = vrot.slane %v518_v44, 4  ;;  %v699_v16 = vrot.slane %v698_v7, 4  ;;  %v2134_v35 = vor.u32 %v2495_v12, %v2133_v11  ;;  %v540_v44 = vshrl.u32 %v1999_v39, 16  ;;  %v2105_v8 = vld [vmem:[#allocation2 + $0x68] sm:$0xf] }
  0x74   : > { %v532_v55 = vor.u32 %v531_v47, %v528_v45  ;;  %v718_v36 = vsel %vm2775_vm2, %v713_v28, %v717_v21  ;;  %v739_v43 = vrot.slane %v737_v33, 5  ;;  %v543_v45 = vshll.u32 %v1999_v39, 16  ;;  %v2487_v9 = vld [vmem:[#allocation2 + $0x88] sm:$0xf0]  ;;  %v2169_v11 = vld [vmem:[#allocation2 + $0xf0] sm:$0xf] }
  0x75   : > { %v524_v1 = vsel %vm2775_vm2, %v519_v50, %v523_v54  ;;  %v704_v27 = vsel %vm2775_vm2, %v699_v16, %v703_v17  ;;  %760 = vst [vmem:[#allocation2 + $0xd4] sm:$0xf] %v718_v36  ;;  %v554_v46 = vshrl.u32 %v2001_v40, 16  ;;  %v557_v47 = vshll.u32 %v2001_v40, 16  ;;  %v2504_v12 = vld [vmem:[#allocation2 + $0x110] sm:$0xf0] }
  0x76   : > { %v533_v2 = vrot.slane %v532_v55, 4  ;;  %579 = vst [vmem:[#allocation2 + $0xa4] sm:$0xf] %v524_v1  ;;  %v740_v50 = vor.u32 %v739_v43, %v736_v37  ;;  %v542_v53 = vrot.slane %v540_v44, 4  ;;  %v545_v54 = vrot.slane %v543_v45, 5 }
  0x77   : > { %759 = vst [vmem:[#allocation2 + $0xb0] sm:$0xf] %v704_v27  ;;  %v549_v55 = vshll.u32 %v2000_v52, 16  ;;  %v556_v59 = vrot.slane %v554_v46, 4  ;;  %v559_v60 = vrot.slane %v557_v47, 5  ;;  %v2106_v14 = vor.u32 %v2487_v9, %v2105_v8 }
  0x78   : > { %v538_v13 = vsel %vm2775_vm2, %v533_v2, %v537_v56  ;;  %v741_v57 = vrot.slane %v740_v50, 4  ;;  %v546_v61 = vor.u32 %v545_v54, %v542_v53  ;;  %v2091_v7 = vld [vmem:[#allocation2 + $0x7c] sm:$0xf0]  ;;  %v2170_v15 = vor.u32 %v2504_v12, %v2169_v11  ;;  %v2500_v16 = vld [vmem:[#allocation2 + $0xf4] sm:$0xf] }
  0x79   : > { %580 = vst [vmem:[#allocation2 + $0xc8] sm:$0xf] %v538_v13  ;;  %v551_v63 = vrot.slane %v549_v55, 5  ;;  %v560_v0 = vor.u32 %v559_v60, %v556_v59  ;;  %v2094_v13 = vor.u32 %v2481_v6, %v2091_v7  ;;  %v2171_v17 = vld [vmem:[#allocation2 + $0x114] sm:$0xf0] }
  0x7a   : > { %v547_v1 = vrot.slane %v546_v61, 4  ;;  %v2174_v18 = vor.u32 %v2500_v16, %v2171_v17 }
  0x7b   : > { %v561_v3 = vrot.slane %v560_v0, 4 }
  0x7c   : > { %1615 = vmatmul.bf16.gmra.mxu1 %v2150_v23  ;;  %1702 = vmatmul.bf16.gmra.mxu0 %v2162_v24  ;;  %v2034_v23 = vld [vmem:[%s2738_s10 + $0x108] sm:$0x1]  ;;  %v723_v24 = vshll.u32 %v2031_v58, 16  ;;  %v2002_v58 = vld [vmem:[%s2738_s10 + $0xf8] sm:$0x1]  ;;  %v552_v4 = vsel %vm2775_vm2, %v547_v1, %v551_v63 }
  0x7d   : > { %v743_v34 = vshll.u32 %v2034_v23, 16  ;;  %v563_v2 = vshll.u32 %v2002_v58, 16  ;;  %581 = vst [vmem:[#allocation2 + $0xec] sm:$0xf] %v552_v4  ;;  %v2496_v22 = vld [vmem:[#allocation2 + $0xd0] sm:$0xf0] }
  0x7e   : > { %1779 = vmatmul.bf16.gmra.mxu3 %v2102_v41  ;;  %v725_v32 = vrot.slane %v723_v24, 5  ;;  %v2141_v21 = vld [vmem:[#allocation2 + $0xb0] sm:$0xf] }
  0x7f   : > { %1750 = vmatmul.bf16.gmra.mxu2 %v2098_v25  ;;  %v2491_v25 = vld [vmem:[#allocation2 + $0xac] sm:$0xf]  ;;  %v745_v51 = vrot.slane %v743_v34, 5  ;;  %v565_v5 = vrot.slane %v563_v2, 5 }
  0x80   : > { %v726_v41 = vor.u32 %v725_v32, %v722_v19  ;;  %v2138_v48 = vor.u32 %v2491_v25, %v2135_v26  ;;  %v2490_v19 = vld [vmem:[#allocation2 + $0xa4] sm:$0xf]  ;;  %v2142_v25 = vor.u32 %v2496_v22, %v2141_v21 }
  0x81   : > { %v746_v62 = vsel %vm2775_vm2, %v741_v57, %v745_v51  ;;  %v566_v10 = vsel %vm2775_vm2, %v561_v3, %v565_v5 }
  0x82   : > { %v727_v49 = vrot.slane %v726_v41, 4  ;;  %762 = vst [vmem:[#allocation2 + $0x11c] sm:$0xf] %v746_v62 }
  0x83   : > { %582 = vst [vmem:[#allocation2 + $0x110] sm:$0xf] %v566_v10 }
  0x84   : > { %v732_v56 = vsel %vm2775_vm2, %v727_v49, %v731_v42  ;;  %v2499_v33 = vld [vmem:[#allocation2 + $0xec] sm:$0xf] }
  0x85   : > { %761 = vst [vmem:[#allocation2 + $0xf8] sm:$0xf] %v732_v56 }
  0x89   : > { %v2505_v38 = vld [vmem:[#allocation2 + $0x118] sm:$0xf0] }
  0x8a   : > { %v2163_v34 = vld [vmem:[#allocation2 + $0x10c] sm:$0xf0] }
  0x8c   : > { %1716 = vmatmul.bf16.vlgmr.msra.gmra.mxu1 %v2058_v20  ;;  %1803 = vmatmul.bf16.vlgmr.msra.gmra.mxu0 %v2070_v31  ;;  %v2127_v20 = vld [vmem:[#allocation2 + $0xc4] sm:$0xf0]  ;;  %v2177_v23 = vld [vmem:[#allocation2 + $0xf8] sm:$0xf] }
  0x8d   : > { %v2130_v24 = vor.u32 %v2490_v19, %v2127_v20  ;;  %v2178_v28 = vor.u32 %v2505_v38, %v2177_v23 }
  0x8e   : > { %1784 = vmatmul.bf16.gmra.mxu3 %v2138_v48 }
  0x8f   : > { %1755 = vmatmul.bf16.gmra.mxu2 %v2134_v35  ;;  %v2166_v35 = vor.u32 %v2499_v33, %v2163_v34 }
  0x9c   : > { %1721 = vmatmul.bf16.gmra.mxu1 %v2094_v13  ;;  %1808 = vmatmul.bf16.gmra.mxu0 %v2106_v14 }
  0x9e   : > { %1789 = vmatmul.bf16.gmra.mxu3 %v2174_v18 }
  0x9f   : > { %1760 = vmatmul.bf16.gmra.mxu2 %v2170_v15 }
  0xa9   : > { %v1582_v26 = vpop.f32.mrf.mxu1  ;;  %v1572_v27 = vpop.f32.mrf.mxu0 }
  0xac   : > { %1726 = vmatmul.bf16.gmra.mxu1 %v2130_v24  ;;  %1813 = vmatmul.bf16.gmra.mxu0 %v2142_v25 }
  0xaf   : > { %1818 = vmatmul.bf16.vlgmr.msra.gmra.mxu2 %v2178_v28 }
  0xb1   : > { %v1584_v30 = vpop.f32.mrf.mxu1  ;;  %v1574_v31 = vpop.f32.mrf.mxu0 }
  0xb2   : > { %v1630_v29 = vpop.f32.mrf.mxu2  ;;  %v1659_v32 = vpop.f32.mrf.mxu3 }
  0xb9   : > { %v1587_v37 = vpop.f32.mrf.mxu1  ;;  %v1577_v39 = vpop.f32.mrf.mxu0 }
  0xba   : > { %v1632_v36 = vpop.f32.mrf.mxu2  ;;  %v3069_v40 = vpop.f32.mrf.mxu3 }
  0xbc   : > { %1731 = vmatmul.bf16.gmra.mxu1 %v2166_v35 }
  0xc1   : > { %v1589_v42 = vpop.f32.mrf.mxu1  ;;  %v1579_v43 = vpop.f32.mrf.mxu0 }
  0xc2   : > { %v1635_v41 = vpop.f32.mrf.mxu2  ;;  %v1664_v44 = vpop.f32.mrf.mxu3 }
  0xc9   : > { %v1601_v46 = vpop.f32.mrf.mxu1  ;;  %v1688_v47 = vpop.f32.mrf.mxu0 }
  0xca   : > { %v1637_v45 = vpop.f32.mrf.mxu2  ;;  %v1602_v48 = vadd.f32 %v1601_v46, %v1572_v27  ;;  %v3071_v50 = vpop.f32.mrf.mxu3 }
  0xcc   : > { %v1631_v49 = vadd.f32 %v1630_v29, %v1602_v48 }
  0xce   : > { %v1660_v51 = vadd.f32 %v1659_v32, %v1631_v49 }
  0xd0   : > { %v1689_v52 = vadd.f32 %v1688_v47, %v1660_v51 }
  0xd1   : > { %v1603_v54 = vpop.f32.mrf.mxu1  ;;  %v1690_v55 = vpop.f32.mrf.mxu0 }
  0xd2   : > { %v1640_v53 = vpop.f32.mrf.mxu2  ;;  %v1604_v56 = vadd.f32 %v1603_v54, %v1574_v31  ;;  %v1669_v58 = vpop.f32.mrf.mxu3 }
  0xd4   : > { %v1633_v57 = vadd.f32 %v1632_v36, %v1604_v56 }
  0xd9   : > { %v1606_v60 = vpop.f32.mrf.mxu1  ;;  %v1693_v61 = vpop.f32.mrf.mxu0 }
  0xda   : > { %v1642_v59 = vpop.f32.mrf.mxu2  ;;  %v1607_v62 = vadd.f32 %v1606_v60, %v1577_v39  ;;  %v3073_v3 = vpop.f32.mrf.mxu3 }
  0xdc   : > { %v1636_v63 = vadd.f32 %v1635_v41, %v1607_v62 }
  0xde   : > { %v1665_v0 = vadd.f32 %v1664_v44, %v1636_v63 }
  0xe0   : > { %v1694_v1 = vadd.f32 %v1693_v61, %v1665_v0 }
  0xe1   : > { %v1608_v4 = vpop.f32.mrf.mxu1  ;;  %v3075_v5 = vpop.f32.mrf.mxu0 }
  0xe2   : > { %v1645_v2 = vpop.f32.mrf.mxu2  ;;  %v1609_v6 = vadd.f32 %v1608_v4, %v1579_v43  ;;  %v1674_v12 = vpop.f32.mrf.mxu3  ;;  %v1662_v43 = vadd.f32 %v3069_v40, %v1633_v57  ;;  %v3101_v40 = vld [vmem:[%s3150_s3] ss:$0 sm:$0xff] }
  0xe4   : > { %v1638_v7 = vadd.f32 %v1637_v45, %v1609_v6  ;;  %v1691_v45 = vadd.f32 %v1690_v55, %v1662_v43 }
  0xe6   : > { %v1667_v62 = vadd.f32 %v3071_v50, %v1638_v7 }
  0xe9   : > { %v1611_v9 = vpop.f32.mrf.mxu1  ;;  %v1698_v10 = vpop.f32.mrf.mxu0 }
  0xea   : > { %v1647_v8 = vpop.f32.mrf.mxu2  ;;  %v1612_v11 = vadd.f32 %v1611_v9, %v1582_v26  ;;  %v3083_v21 = vpop.f32.mrf.mxu3 }
  0xec   : > { %v1641_v13 = vadd.f32 %v1640_v53, %v1612_v11 }
  0xee   : > { %v1670_v14 = vadd.f32 %v1669_v58, %v1641_v13 }
  0xf0   : > { %v3077_v15 = vadd.f32 %v1698_v10, %v1670_v14  ;;  %v1696_v10 = vadd.f32 %v3075_v5, %v1667_v62 }
  0xf1   : > { %v1613_v17 = vpop.f32.mrf.mxu1  ;;  %v3079_v18 = vpop.f32.mrf.mxu0 }
  0xf2   : > { %v1746_v16 = vpop.f32.mrf.mxu2  ;;  %v1614_v19 = vadd.f32 %v1613_v17, %v1584_v30  ;;  %v1775_v27 = vpop.f32.mrf.mxu3 }
  0xf4   : > { %v3081_v20 = vadd.f32 %v1642_v59, %v1614_v19 }
  0xf9   : > { %v1616_v23 = vpop.f32.mrf.mxu1  ;;  %v1703_v38 = vpop.f32.mrf.mxu0 }
  0xfa   : > { %v1748_v22 = vpop.f32.mrf.mxu2  ;;  %v1617_v24 = vadd.f32 %v1616_v23, %v1587_v37  ;;  %v1777_v30 = vpop.f32.mrf.mxu3 }
  0xfc   : > { %v1646_v25 = vadd.f32 %v1645_v2, %v1617_v24 }
  0xfe   : > { %v1675_v26 = vadd.f32 %v1674_v12, %v1646_v25 }
 0x100   : > { %v3085_v28 = vadd.f32 %v1703_v38, %v1675_v26  ;;  %v1672_v26 = vadd.f32 %v3073_v3, %v3081_v20 }
 0x101   : > { %v1618_v31 = vpop.f32.mrf.mxu1  ;;  %v3087_v32 = vpop.f32.mrf.mxu0 }
 0x102   : > { %v1751_v29 = vpop.f32.mrf.mxu2  ;;  %v1619_v33 = vadd.f32 %v1618_v31, %v1589_v42  ;;  %v3095_v42 = vld [vmem:[%s3149_s2] ss:$0 sm:$0xff]  ;;  %v1780_v51 = vpop.f32.mrf.mxu3 }
 0x104   : > { %v3089_v34 = vadd.f32 %v1647_v8, %v1619_v33 }
 0x109   : > { %v1717_v35 = vpop.f32.mrf.mxu1  ;;  %v1804_v36 = vpop.f32.mrf.mxu0 }
 0x10a   : > { %v1718_v39 = vadd.f32 %v1717_v35, %v1689_v52  ;;  %v1753_v41 = vpop.f32.mrf.mxu2  ;;  %v1782_v2 = vpop.f32.mrf.mxu3  ;;  %v1701_v35 = vadd.f32 %v3079_v18, %v1672_v26 }
 0x10c   : > { %v1747_v37 = vadd.f32 %v1746_v16, %v1718_v39 }
 0x10e   : > { %v1776_v44 = vadd.f32 %v1775_v27, %v1747_v37 }
 0x110   : > { %v1805_v48 = vadd.f32 %v1804_v36, %v1776_v44 }
 0x111   : > { %v1719_v46 = vpop.f32.mrf.mxu1  ;;  %v1806_v47 = vpop.f32.mrf.mxu0 }
 0x112   : > { %v1720_v49 = vadd.f32 %v1719_v46, %v1691_v45  ;;  %v1756_v54 = vpop.f32.mrf.mxu2  ;;  %v1828_v52 = vmul.f32 %v3095_v42, %v1805_v48  ;;  %v1785_v17 = vpop.f32.mrf.mxu3 }
 0x114   : > { %v1749_v53 = vadd.f32 %v1748_v22, %v1720_v49  ;;  %v1840_v59 = vadd.f32 %v3101_v40, %v1828_v52 }
 0x116   : > { %v1778_v55 = vadd.f32 %v1777_v30, %v1749_v53  ;;  %v1848_v4 = vmax.f32 %v1840_v59, 0.0  ;;  %v1677_v53 = vadd.f32 %v3083_v21, %v3089_v34 }
 0x118   : > { %v1807_v56 = vadd.f32 %v1806_v47, %v1778_v55  ;;  %v1706_v59 = vadd.f32 %v3087_v32, %v1677_v53 }
 0x119   : > { %v1722_v57 = vpop.f32.mrf.mxu1  ;;  %v1809_v58 = vpop.f32.mrf.mxu0 }
 0x11a   : > { %v1829_v60 = vmul.f32 %v3095_v42, %v1807_v56  ;;  %v1723_v61 = vadd.f32 %v1722_v57, %v1694_v1  ;;  %v1758_v9 = vpop.f32.mrf.mxu2  ;;  %v1787_v39 = vpop.f32.mrf.mxu3 }
 0x11c   : > { %v1841_v63 = vadd.f32 %v3101_v40, %v1829_v60  ;;  %v1752_v0 = vadd.f32 %v1751_v29, %v1723_v61 }
 0x11e   : > { %v1849_v6 = vmax.f32 %v1841_v63, 0.0  ;;  %v1781_v8 = vadd.f32 %v1780_v51, %v1752_v0 }
 0x120   : > { %v2581_v1 = vpack.c.bf16 %v1849_v6, %v1848_v4  ;;  %v1810_v7 = vadd.f32 %v1809_v58, %v1781_v8 }
 0x121   : > { %v1724_v11 = vpop.f32.mrf.mxu1  ;;  %v1811_v50 = vpop.f32.mrf.mxu0 }
 0x122   : > { %2582 = vst [vmem:[%s3111_s25] sm:$0xff] %v2581_v1   ;;  %v1725_v12 = vadd.f32 %v1724_v11, %v1696_v10  ;;  %v1830_v14 = vmul.f32 %v3095_v42, %v1810_v7  ;;  %v1761_v22 = vpop.f32.mrf.mxu2  ;;  %v1790_v51 = vpop.f32.mrf.mxu3 }
 0x124   : > { %v1754_v13 = vadd.f32 %v1753_v41, %v1725_v12  ;;  %v1842_v38 = vadd.f32 %v3101_v40, %v1830_v14 }
 0x126   : > { %v1783_v16 = vadd.f32 %v1782_v2, %v1754_v13  ;;  %v1850_v31 = vmax.f32 %v1842_v38, 0.0 }
 0x128   : > { %v1812_v19 = vadd.f32 %v1811_v50, %v1783_v16 }
 0x129   : > { %v1727_v23 = vpop.f32.mrf.mxu1  ;;  %v1814_v25 = vpop.f32.mrf.mxu0 }
 0x12a   : > { %v1831_v24 = vmul.f32 %v3095_v42, %v1812_v19  ;;  %v1728_v5 = vadd.f32 %v1727_v23, %v3077_v15  ;;  %v1763_v44 = vpop.f32.mrf.mxu2  ;;  %v1792_v0 = vpop.f32.mrf.mxu3 }
 0x12c   : > { %v1843_v27 = vadd.f32 %v3101_v40, %v1831_v24  ;;  %v1757_v29 = vadd.f32 %v1756_v54, %v1728_v5 }
 0x12e   : > { %v1851_v33 = vmax.f32 %v1843_v27, 0.0  ;;  %v1786_v30 = vadd.f32 %v1785_v17, %v1757_v29 }
 0x130   : > { %v2586_v36 = vpack.c.bf16 %v1851_v33, %v1850_v31  ;;  %v1815_v43 = vadd.f32 %v1814_v25, %v1786_v30 }
 0x131   : > { %v1729_v41 = vpop.f32.mrf.mxu1  ;;  %v1816_v45 = vpop.f32.mrf.mxu0 }
 0x132   : > { %2598 = vst [vmem:[%s3111_s25 + $0x8] sm:$0xff] %v2586_v36   ;;  %v1730_v37 = vadd.f32 %v1729_v41, %v1701_v35  ;;  %v1832_v46 = vmul.f32 %v3095_v42, %v1815_v43  ;;  %v1819_v55 = vpop.f32.mrf.mxu2 }
 0x134   : > { %v1759_v15 = vadd.f32 %v1758_v9, %v1730_v37  ;;  %v1844_v48 = vadd.f32 %v3101_v40, %v1832_v46 }
 0x136   : > { %v1788_v3 = vadd.f32 %v1787_v39, %v1759_v15  ;;  %v1852_v56 = vmax.f32 %v1844_v48, 0.0 }
 0x138   : > { %v1817_v20 = vadd.f32 %v1816_v45, %v1788_v3 }
 0x139   : > { %v1732_v47 = vpop.f32.mrf.mxu1 }
 0x13a   : > { %v1833_v49 = vmul.f32 %v3095_v42, %v1817_v20  ;;  %v1733_v18 = vadd.f32 %v1732_v47, %v3085_v28  ;;  %v1821_v34 = vpop.f32.mrf.mxu2 }
 0x13c   : > { %v1845_v54 = vadd.f32 %v3101_v40, %v1833_v49  ;;  %v1762_v52 = vadd.f32 %v1761_v22, %v1733_v18 }
 0x13e   : > { %v1853_v57 = vmax.f32 %v1845_v54, 0.0  ;;  %v1791_v58 = vadd.f32 %v1790_v51, %v1762_v52 }
 0x140   : > { %v2591_v60 = vpack.c.bf16 %v1853_v57, %v1852_v56  ;;  %v1820_v62 = vadd.f32 %v1819_v55, %v1791_v58 }
 0x141   : > { %v1734_v61 = vpop.f32.mrf.mxu1 }
 0x142   : > { %2599 = vst [vmem:[%s3111_s25 + $0x10] sm:$0xff] %v2591_v60   ;;  %v1735_v63 = vadd.f32 %v1734_v61, %v1706_v59  ;;  %v1834_v2 = vmul.f32 %v3095_v42, %v1820_v62 }
 0x144   : > { %v1764_v28 = vadd.f32 %v1763_v44, %v1735_v63  ;;  %v1846_v6 = vadd.f32 %v3101_v40, %v1834_v2 }
 0x146   : > { %v1793_v21 = vadd.f32 %v1792_v0, %v1764_v28  ;;  %v1854_v32 = vmax.f32 %v1846_v6, 0.0 }
 0x148   : > { %v1822_v4 = vadd.f32 %v1821_v34, %v1793_v21 }
 0x14a   : > { %v1835_v8 = vmul.f32 %v3095_v42, %v1822_v4 }
 0x14c   : > { %v1847_v9 = vadd.f32 %v3101_v40, %v1835_v8 }
 0x14e   : > { %v1855_v10 = vmax.f32 %v1847_v9, 0.0 }
 0x150   : > { %v2596_v1 = vpack.c.bf16 %v1855_v10, %v1854_v32 }
 0x152   : > { %2600 = vst [vmem:[%s3111_s25 + $0x18] sm:$0xff] %v2596_v1  }
 0x153 PF: > { %s14_s17 = sadd.s32 1, %s2666_s17   ;;  %s3154_s15 = smov %s2662_s16 }
 0x154   : > { %p11_p5 = scmp.ge.s32.totalorder %s14_s17, 4   ;;  %s3155_s16 = smov %s3157_s18 }
 0x156   :  { %13 = sbr.rel (!%p11_p5) target bundleno = 2 (0x2), region = 69 }

</bundles_post_ra>
